<compile_context>
chip_gen: v6e
topology: v6e:2x2x1
jax: 0.10.0
libtpu: 0.0.40
codegen_flags: <defaults>
</compile_context>

<pallas_src>
import jax
import jax.numpy as jnp
from jax.experimental import pallas as pl
from jax.experimental.pallas import tpu as pltpu

N_LAYERS = 2  # static, matches module default

# bf16 MXU operands with f32 accumulation on real TPUs; plain f32 elsewhere
# (the CPU executor has no BF16xBF16=F32 dot thunk).
_ON_TPU = jax.default_backend() == "tpu"
COMPUTE_DTYPE = jnp.bfloat16 if _ON_TPU else jnp.float32


def _round_up(x, m):
    return (x + m - 1) // m * m


# ----------------------------------------------------------------------------
# Fused kernel: block-adjacency GNN propagation + mean-over-layers +
# MetaNetwork MLP epilogue. All operands are whole-array VMEM blocks (shapes
# padded lane-dense by the wrapper: full MXU tiles, unmasked stores).
# ----------------------------------------------------------------------------
def _fused_kernel(a_ref, e0_ref, w1_ref, b1_ref, w2_ref, b2_ref,
                  main_ref, aux_ref):
    # ---- HeterogeneousGNN: E_{l+1} = A @ E_l, mean over layers 0..N_LAYERS.
    e0 = e0_ref[...]                       # (Mp, Dp) f32
    acc = e0                               # f32 layer-sum accumulator
    e = e0.astype(COMPUTE_DTYPE)           # matmul operand (cast once up front)
    # Static unroll: N_LAYERS == 2. If n_layers grows, switch to
    # lax.fori_loop(..., unroll=True) so live ranges stay bounded.
    for _ in range(N_LAYERS):
        e_next = jnp.dot(a_ref[...], e, preferred_element_type=jnp.float32)
        acc = acc + e_next
        e = e_next.astype(COMPUTE_DTYPE)

    main = acc * jnp.float32(1.0 / (N_LAYERS + 1))
    main_ref[...] = main

    # ---- MetaNetwork (shared MLP), applied once to the concatenated
    # (Mp, Dp) main embedding:  out = relu(x @ W1 + b1) @ W2 + b2.
    h = jnp.dot(main.astype(COMPUTE_DTYPE), w1_ref[...],
                preferred_element_type=jnp.float32) + b1_ref[...]
    h = jnp.maximum(h, 0.0)
    aux_ref[...] = jnp.dot(h.astype(COMPUTE_DTYPE), w2_ref[...],
                           preferred_element_type=jnp.float32) + b2_ref[...]


# ----------------------------------------------------------------------------
# Full model forward: pad to lane-dense shapes, build the block adjacency,
# one pallas_call, slice logical user/item rows back out.
# ----------------------------------------------------------------------------
@jax.jit
def hetero_contrastive_forward(params, user_graph, user_item_graph, item_graph):
    U, D = params["user_emb"].shape
    I = params["item_emb"].shape[0]
    H = params["w1"].shape[1]

    # Lane-dense padding: every matmul dim a multiple of 128 (full MXU tiles,
    # unmasked vst stores).
    Up, Ip, Dp, Hp = (_round_up(x, 128) for x in (U, I, D, H))
    Mp = Up + Ip

    def pad2(x, r, c):
        return jnp.pad(x, ((0, r - x.shape[0]), (0, c - x.shape[1])))

    # Block adjacency A = [[uu, ui], [ui^T, ii]]; transpose done ONCE here,
    # outside the kernel. Zero padding keeps the block matmul exact.
    uu = pad2(user_graph, Up, Up)
    ui = pad2(user_item_graph, Up, Ip)
    ii = pad2(item_graph, Ip, Ip)
    a = jnp.concatenate(
        [jnp.concatenate([uu, ui], axis=1),
         jnp.concatenate([ui.T, ii], axis=1)],
        axis=0).astype(COMPUTE_DTYPE)                              # (Mp, Mp)

    e0 = jnp.concatenate(
        [pad2(params["user_emb"], Up, Dp),
         pad2(params["item_emb"], Ip, Dp)],
        axis=0).astype(jnp.float32)                                # (Mp, Dp)

    w1 = pad2(params["w1"], Dp, Hp).astype(COMPUTE_DTYPE)
    b1 = pad2(params["b1"], 1, Hp).astype(jnp.float32)
    w2 = pad2(params["w2"], Hp, Dp).astype(COMPUTE_DTYPE)
    b2 = pad2(params["b2"], 1, Dp).astype(jnp.float32)

    # Advisory cost estimate (GNN flops no longer double-counted).
    gnn_flops = N_LAYERS * 2 * Mp * Mp * Dp
    mlp_flops = 4 * Mp * Dp * Hp
    item = jnp.dtype(COMPUTE_DTYPE).itemsize
    bytes_accessed = (item * (Mp * Mp + Dp * Hp + Hp * Dp)   # A, W1, W2
                      + 4 * (Mp * Dp + Hp + Dp)              # E0, b1, b2
                      + 4 * 2 * Mp * Dp)                     # main, aux outs
    cost = pl.CostEstimate(flops=gnn_flops + mlp_flops,
                           transcendentals=0,
                           bytes_accessed=bytes_accessed)

    # VMEM budget derived from the actual working set (not a fixed 32 MiB);
    # clamp below physical VMEM. At production scale re-derive per generation.
    vmem_limit = min(2 * int(bytes_accessed) + (8 << 20), 100 << 20)

    vspec = pl.BlockSpec(memory_space=pltpu.MemorySpace.VMEM)
    main_p, aux_p = pl.pallas_call(
        _fused_kernel,
        out_shape=(jax.ShapeDtypeStruct((Mp, Dp), jnp.float32),
                   jax.ShapeDtypeStruct((Mp, Dp), jnp.float32)),
        in_specs=[vspec] * 6,
        out_specs=(vspec, vspec),
        compiler_params=pltpu.CompilerParams(vmem_limit_bytes=vmem_limit),
        cost_estimate=cost,
    )(a, e0, w1, b1, w2, b2)

    # Padded rows are never consumed directly: slice back to logical shapes.
    return (main_p[:U, :D], main_p[Up:Up + I, :D],
            aux_p[:U, :D], aux_p[Up:Up + I, :D])


# ----------------------------------------------------------------------------
# Pure-JAX f32 reference of the same semantics (correctness check).
# ----------------------------------------------------------------------------
def reference_forward(params, user_graph, user_item_graph, item_graph):
    u = params["user_emb"]
    it = params["item_emb"]
    u_acc, i_acc = u, it
    for _ in range(N_LAYERS):
        u_new = user_graph @ u + user_item_graph @ it
        i_new = item_graph @ it + user_item_graph.T @ u
        u, it = u_new, i_new
        u_acc = u_acc + u
        i_acc = i_acc + it
    u_main = u_acc / (N_LAYERS + 1)
    i_main = i_acc / (N_LAYERS + 1)

    def mlp(x):
        h = jnp.maximum(x @ params["w1"] + params["b1"], 0.0)
        return h @ params["w2"] + params["b2"]

    return u_main, i_main, mlp(u_main), mlp(i_main)


if __name__ == "__main__":
    user_num, item_num, embed_dim = 64, 48, 32
    key = jax.random.PRNGKey(0)
    ks = jax.random.split(key, 8)

    # Deterministic synthetic parameters (no checkpoint load).
    params = {
        "user_emb": 0.1 * jax.random.normal(ks[0], (user_num, embed_dim), jnp.float32),
        "item_emb": 0.1 * jax.random.normal(ks[1], (item_num, embed_dim), jnp.float32),
        "w1": (1.0 / jnp.sqrt(embed_dim)) *
              jax.random.normal(ks[2], (embed_dim, 2 * embed_dim), jnp.float32),
        "b1": jnp.zeros((1, 2 * embed_dim), jnp.float32),
        "w2": (1.0 / jnp.sqrt(2 * embed_dim)) *
              jax.random.normal(ks[3], (2 * embed_dim, embed_dim), jnp.float32),
        "b2": jnp.zeros((1, embed_dim), jnp.float32),
    }

    # Dense, row-normalized random adjacency graphs.
    def rand_adj(k, shape):
        adj = (jax.random.uniform(k, shape) < 0.2).astype(jnp.float32)
        deg = jnp.maximum(adj.sum(axis=1, keepdims=True), 1.0)
        return adj / deg

    user_graph = rand_adj(ks[4], (user_num, user_num))
    user_item_graph = rand_adj(ks[5], (user_num, item_num))
    item_graph = rand_adj(ks[6], (item_num, item_num))

    outs = hetero_contrastive_forward(params, user_graph, user_item_graph, item_graph)
    outs = jax.block_until_ready(outs)

    refs = reference_forward(params, user_graph, user_item_graph, item_graph)
    for o, r in zip(outs, refs):
        assert o.shape == r.shape and o.dtype == jnp.float32
        assert bool(jnp.isfinite(o).all())
        # bf16 MXU operands on TPU -> loosened tolerance vs the f32 reference.
        assert jnp.allclose(o, r, atol=2e-2, rtol=2e-2), "mismatch vs reference"

    print("KERNEL_OK")
</pallas_src>

<mosaic_0001>
module attributes {stable_mosaic.version = 11 : i64} {
  func.func @_fused_kernel(%arg0: memref<256x256xf32, #tpu.memory_space<vmem>>, %arg1: memref<256x128xf32, #tpu.memory_space<vmem>>, %arg2: memref<128x128xf32, #tpu.memory_space<vmem>>, %arg3: memref<1x128xf32, #tpu.memory_space<vmem>>, %arg4: memref<128x128xf32, #tpu.memory_space<vmem>>, %arg5: memref<1x128xf32, #tpu.memory_space<vmem>>, %arg6: memref<256x128xf32, #tpu.memory_space<vmem>>, %arg7: memref<256x128xf32, #tpu.memory_space<vmem>>) attributes {dimension_semantics = [], scalar_prefetch = 0 : i64, scratch_operands = 0 : i64, tpu.core_type = #tpu.core_type<tc>} {
    %c0 = arith.constant 0 : index
    %c0_0 = arith.constant 0 : index
    %0 = vector.load %arg1[%c0, %c0_0] : memref<256x128xf32, #tpu.memory_space<vmem>>, vector<256x128xf32>
    %c0_1 = arith.constant 0 : index
    %c0_2 = arith.constant 0 : index
    %1 = vector.load %arg0[%c0_1, %c0_2] : memref<256x256xf32, #tpu.memory_space<vmem>>, vector<256x256xf32>
    %cst = arith.constant dense<0.000000e+00> : vector<256x128xf32>
    %2 = tpu.matmul %1, %0, %cst {dimension_numbers = #tpu.dot_dimension_numbers<[1], [0], [0], [1], [0, 0, 1, 1], [], []>} : vector<256x256xf32>, vector<256x128xf32>, vector<256x128xf32> -> vector<256x128xf32>
    %3 = arith.addf %0, %2 : vector<256x128xf32>
    %c0_3 = arith.constant 0 : index
    %c0_4 = arith.constant 0 : index
    %4 = vector.load %arg0[%c0_3, %c0_4] : memref<256x256xf32, #tpu.memory_space<vmem>>, vector<256x256xf32>
    %cst_5 = arith.constant dense<0.000000e+00> : vector<256x128xf32>
    %5 = tpu.matmul %4, %2, %cst_5 {dimension_numbers = #tpu.dot_dimension_numbers<[1], [0], [0], [1], [0, 0, 1, 1], [], []>} : vector<256x256xf32>, vector<256x128xf32>, vector<256x128xf32> -> vector<256x128xf32>
    %6 = arith.addf %3, %5 : vector<256x128xf32>
    %cst_6 = arith.constant 0.333333343 : f32
    %7 = vector.broadcast %cst_6 : f32 to vector<256x128xf32>
    %8 = arith.mulf %6, %7 : vector<256x128xf32>
    %c0_7 = arith.constant 0 : index
    %c0_8 = arith.constant 0 : index
    %9 = vector.load %arg6[%c0_7, %c0_8] : memref<256x128xf32, #tpu.memory_space<vmem>>, vector<256x128xf32>
    tpu.vector_store %arg6[%c0_7, %c0_8], %8 {strides = array<i32>} : memref<256x128xf32, #tpu.memory_space<vmem>>, vector<256x128xf32>,
    %c0_9 = arith.constant 0 : index
    %c0_10 = arith.constant 0 : index
    %10 = vector.load %arg2[%c0_9, %c0_10] : memref<128x128xf32, #tpu.memory_space<vmem>>, vector<128x128xf32>
    %cst_11 = arith.constant dense<0.000000e+00> : vector<256x128xf32>
    %11 = tpu.matmul %8, %10, %cst_11 {dimension_numbers = #tpu.dot_dimension_numbers<[1], [0], [0], [1], [0, 0, 1, 1], [], []>} : vector<256x128xf32>, vector<128x128xf32>, vector<256x128xf32> -> vector<256x128xf32>
    %c0_12 = arith.constant 0 : index
    %c0_13 = arith.constant 0 : index
    %12 = vector.load %arg3[%c0_12, %c0_13] : memref<1x128xf32, #tpu.memory_space<vmem>>, vector<1x128xf32>
    %13 = vector.broadcast %12 : vector<1x128xf32> to vector<256x128xf32>
    %14 = arith.addf %11, %13 : vector<256x128xf32>
    %cst_14 = arith.constant 0.000000e+00 : f32
    %15 = vector.broadcast %cst_14 : f32 to vector<256x128xf32>
    %16 = arith.maximumf %14, %15 : vector<256x128xf32>
    %c0_15 = arith.constant 0 : index
    %c0_16 = arith.constant 0 : index
    %17 = vector.load %arg4[%c0_15, %c0_16] : memref<128x128xf32, #tpu.memory_space<vmem>>, vector<128x128xf32>
    %cst_17 = arith.constant dense<0.000000e+00> : vector<256x128xf32>
    %18 = tpu.matmul %16, %17, %cst_17 {dimension_numbers = #tpu.dot_dimension_numbers<[1], [0], [0], [1], [0, 0, 1, 1], [], []>} : vector<256x128xf32>, vector<128x128xf32>, vector<256x128xf32> -> vector<256x128xf32>
    %c0_18 = arith.constant 0 : index
    %c0_19 = arith.constant 0 : index
    %19 = vector.load %arg5[%c0_18, %c0_19] : memref<1x128xf32, #tpu.memory_space<vmem>>, vector<1x128xf32>
    %20 = vector.broadcast %19 : vector<1x128xf32> to vector<256x128xf32>
    %21 = arith.addf %18, %20 : vector<256x128xf32>
    %c0_20 = arith.constant 0 : index
    %c0_21 = arith.constant 0 : index
    %22 = vector.load %arg7[%c0_20, %c0_21] : memref<256x128xf32, #tpu.memory_space<vmem>>, vector<256x128xf32>
    tpu.vector_store %arg7[%c0_20, %c0_21], %21 {strides = array<i32>} : memref<256x128xf32, #tpu.memory_space<vmem>>, vector<256x128xf32>,
    return
  }
}

</mosaic_0001>

<bundles_post_ra>
// kernel: hetero_contrastive_forward.1
= control target key start
LH: loop header
LB: loop body
LE: loop exit
PB: predicated region body
PF: predicated region fallthrough
CT: control target
= control target key end

     0   :  { %v2797_v0 = vmov 0.0   ;;  %s2789_s1 = inlined_call_operand.vmem [shape: f32[256,128], index: 1, kind: input, shape index: {}]   ;;  %s2790_s0 = inlined_call_operand.vmem [shape: f32[256,256], index: 0, kind: input, shape index: {}]   ;;  %s2791_s2 = inlined_call_operand.vmem [shape: f32[128,128], index: 2, kind: input, shape index: {}]   ;;  %s2792_s4 = inlined_call_operand.vmem [shape: f32[128,128], index: 4, kind: input, shape index: {}]   ;;  %s2793_s6 = inlined_call_operand.vmem [shape: f32[256,128], index: 6, kind: output, shape index: {0}]   ;;  %s2794_s3 = inlined_call_operand.vmem [shape: f32[1,128], index: 3, kind: input, shape index: {}]   ;;  %s2795_s5 = inlined_call_operand.vmem [shape: f32[1,128], index: 5, kind: input, shape index: {}]   ;;  %s2796_s7 = inlined_call_operand.vmem [shape: f32[256,128], index: 7, kind: output, shape index: {1}]  }
   0x1   :  { %121 = vmatprep.subr.mxu0 %v2797_v0  ;;  %v40_v1 = vld [vmem:[%s2789_s1 + $0x78] sm:$0xff]  ;;  %v39_v2 = vld [vmem:[%s2789_s1 + $0x70] sm:$0xff]  ;;  %378 = vmatprep.subr.mxu1 %v2797_v0  ;;  %v38_v3 = vld [vmem:[%s2789_s1 + $0x68] sm:$0xff] }
   0x2   :  { %122 = vmatpush1.msra.mxu0 %v40_v1  ;;  %v37_v4 = vld [vmem:[%s2789_s1 + $0x60] sm:$0xff]  ;;  %v36_v5 = vld [vmem:[%s2789_s1 + $0x58] sm:$0xff]  ;;  %v35_v6 = vld [vmem:[%s2789_s1 + $0x50] sm:$0xff] }
   0x3   :  { %123 = vmatprep.subr.mxu0 %v2797_v0  ;;  %v34_v7 = vld [vmem:[%s2789_s1 + $0x48] sm:$0xff]  ;;  %v33_v9 = vld [vmem:[%s2789_s1 + $0x40] sm:$0xff]  ;;  %v32_v10 = vld [vmem:[%s2789_s1 + $0x38] sm:$0xff] }
   0x4   :  { %124 = vmatpush1.msra.mxu0 %v39_v2  ;;  %v58_v8 = vld [vmem:[%s2790_s0 + $0x8] sm:$0xff]  ;;  %v1635_v11 = vld [vmem:[%s2789_s1 + $0x30] sm:$0xff]  ;;  %v1648_v13 = vld [vmem:[%s2789_s1 + $0x20] sm:$0xff] }
   0x5   :  { %125 = vmatprep.subr.mxu0 %v2797_v0  ;;  %185 = vmatprep.mubr.f32.mxu0 %v58_v8  ;;  %2845 = vst [vmem:[#allocation2_spill] sm:$0xff] %v1635_v11  ;;  %v1641_v12 = vld [vmem:[%s2789_s1 + $0x28] sm:$0xff]  ;;  %2847 = vst [vmem:[#allocation4_spill] sm:$0xff] %v1648_v13  ;;  %v1655_v14 = vld [vmem:[%s2789_s1 + $0x18] sm:$0xff] }
   0x6   :  { %126 = vmatpush1.msra.mxu0 %v38_v3  ;;  %442 = vmatprep.mubr.f32.mxu1 %v58_v8  ;;  %2846 = vst [vmem:[#allocation3_spill] sm:$0xff] %v1641_v12  ;;  %2848 = vst [vmem:[#allocation5_spill] sm:$0xff] %v1655_v14  ;;  %v1662_v15 = vld [vmem:[%s2789_s1 + $0x10] sm:$0xff]  ;;  %v1669_v16 = vld [vmem:[%s2789_s1 + $0x8] sm:$0xff] }
   0x7   :  { %127 = vmatprep.subr.mxu0 %v2797_v0  ;;  %2849 = vst [vmem:[#allocation6_spill] sm:$0xff] %v1662_v15  ;;  %2850 = vst [vmem:[#allocation7_spill] sm:$0xff] %v1669_v16  ;;  %v1676_v17 = vld [vmem:[%s2789_s1] sm:$0xff]  ;;  %v56_v18 = vld [vmem:[%s2789_s1 + $0xf8] sm:$0xff] }
   0x8   :  { %128 = vmatpush1.msra.mxu0 %v37_v4  ;;  %2851 = vst [vmem:[#allocation8_spill] sm:$0xff] %v1676_v17  ;;  %v55_v19 = vld [vmem:[%s2789_s1 + $0xf0] sm:$0xff]  ;;  %v54_v20 = vld [vmem:[%s2789_s1 + $0xe8] sm:$0xff]  ;;  %v53_v21 = vld [vmem:[%s2789_s1 + $0xe0] sm:$0xff] }
   0x9   :  { %129 = vmatprep.subr.mxu0 %v2797_v0  ;;  %v52_v22 = vld [vmem:[%s2789_s1 + $0xd8] sm:$0xff]  ;;  %v51_v23 = vld [vmem:[%s2789_s1 + $0xd0] sm:$0xff]  ;;  %v50_v24 = vld [vmem:[%s2789_s1 + $0xc8] sm:$0xff] }
   0xa   :  { %130 = vmatpush1.msra.mxu0 %v36_v5  ;;  %v49_v25 = vld [vmem:[%s2789_s1 + $0xc0] sm:$0xff]  ;;  %v48_v26 = vld [vmem:[%s2789_s1 + $0xb8] sm:$0xff]  ;;  %v47_v27 = vld [vmem:[%s2789_s1 + $0xb0] sm:$0xff] }
   0xb   :  { %131 = vmatprep.subr.mxu0 %v2797_v0  ;;  %v46_v28 = vld [vmem:[%s2789_s1 + $0xa8] sm:$0xff]  ;;  %v45_v29 = vld [vmem:[%s2789_s1 + $0xa0] sm:$0xff]  ;;  %v44_v30 = vld [vmem:[%s2789_s1 + $0x98] sm:$0xff] }
   0xc   :  { %132 = vmatpush1.msra.mxu0 %v35_v6  ;;  %v43_v31 = vld [vmem:[%s2789_s1 + $0x90] sm:$0xff]  ;;  %v42_v32 = vld [vmem:[%s2789_s1 + $0x88] sm:$0xff]  ;;  %v41_v33 = vld [vmem:[%s2789_s1 + $0x80] sm:$0xff] }
   0xd   :  { %133 = vmatprep.subr.mxu0 %v2797_v0  ;;  %v1747_v34 = vld [vmem:[%s2790_s0] sm:$0xff]  ;;  %v1753_v35 = vld [vmem:[%s2790_s0 + $0x18] sm:$0xff]  ;;  %v1760_v36 = vld [vmem:[%s2790_s0 + $0x10] sm:$0xff] }
   0xe   :  { %134 = vmatpush1.msra.mxu0 %v34_v7  ;;  %v1765_v37 = vld [vmem:[%s2790_s0 + $0x28] sm:$0xff]  ;;  %v1772_v38 = vld [vmem:[%s2790_s0 + $0x20] sm:$0xff]  ;;  %v1777_v39 = vld [vmem:[%s2790_s0 + $0x38] sm:$0xff] }
   0xf   :  { %135 = vmatprep.subr.mxu0 %v2797_v0  ;;  %v1784_v40 = vld [vmem:[%s2790_s0 + $0x30] sm:$0xff]  ;;  %v1789_v41 = vld [vmem:[%s2790_s0 + $0x48] sm:$0xff]  ;;  %v1796_v42 = vld [vmem:[%s2790_s0 + $0x40] sm:$0xff] }
  0x10   :  { %136 = vmatpush1.msra.mxu0 %v33_v9  ;;  %v1801_v43 = vld [vmem:[%s2790_s0 + $0x58] sm:$0xff]  ;;  %v1808_v44 = vld [vmem:[%s2790_s0 + $0x50] sm:$0xff]  ;;  %v1813_v45 = vld [vmem:[%s2790_s0 + $0x68] sm:$0xff] }
  0x11   :  { %137 = vmatprep.subr.mxu0 %v2797_v0  ;;  %v1820_v46 = vld [vmem:[%s2790_s0 + $0x60] sm:$0xff]  ;;  %v1825_v47 = vld [vmem:[%s2790_s0 + $0x78] sm:$0xff]  ;;  %v1832_v48 = vld [vmem:[%s2790_s0 + $0x70] sm:$0xff] }
  0x12   :  { %138 = vmatpush1.msra.mxu0 %v32_v10  ;;  %v1837_v49 = vld [vmem:[%s2790_s0 + $0x88] sm:$0xff]  ;;  %v1844_v50 = vld [vmem:[%s2790_s0 + $0x80] sm:$0xff]  ;;  %v1849_v51 = vld [vmem:[%s2790_s0 + $0x98] sm:$0xff] }
  0x13   :  { %139 = vmatprep.subr.mxu0 %v2797_v0  ;;  %v1856_v52 = vld [vmem:[%s2790_s0 + $0x90] sm:$0xff]  ;;  %v1861_v53 = vld [vmem:[%s2790_s0 + $0xa8] sm:$0xff]  ;;  %v1868_v54 = vld [vmem:[%s2790_s0 + $0xa0] sm:$0xff] }
  0x14   :  { %140 = vmatpush1.msra.mxu0 %v1635_v11  ;;  %v1873_v55 = vld [vmem:[%s2790_s0 + $0xb8] sm:$0xff]  ;;  %v1880_v56 = vld [vmem:[%s2790_s0 + $0xb0] sm:$0xff]  ;;  %v1885_v57 = vld [vmem:[%s2790_s0 + $0xc8] sm:$0xff] }
  0x15   :  { %141 = vmatprep.subr.mxu0 %v2797_v0  ;;  %v1892_v58 = vld [vmem:[%s2790_s0 + $0xc0] sm:$0xff]  ;;  %v1897_v59 = vld [vmem:[%s2790_s0 + $0xd8] sm:$0xff]  ;;  %v1904_v60 = vld [vmem:[%s2790_s0 + $0xd0] sm:$0xff] }
  0x16   :  { %142 = vmatpush1.msra.mxu0 %v1641_v12  ;;  %v1909_v61 = vld [vmem:[%s2790_s0 + $0xe8] sm:$0xff]  ;;  %v1916_v62 = vld [vmem:[%s2790_s0 + $0xe0] sm:$0xff]  ;;  %v1921_v63 = vld [vmem:[%s2790_s0 + $0xf8] sm:$0xff] }
  0x17   :  { %143 = vmatprep.subr.mxu0 %v2797_v0  ;;  %v1928_v1 = vld [vmem:[%s2790_s0 + $0xf0] sm:$0xff]  ;;  %v1933_v2 = vld [vmem:[%s2790_s0 + $0x108] sm:$0xff]  ;;  %v1940_v3 = vld [vmem:[%s2790_s0 + $0x100] sm:$0xff] }
  0x18   :  { %144 = vmatpush1.msra.mxu0 %v1648_v13  ;;  %v1945_v4 = vld [vmem:[%s2790_s0 + $0x118] sm:$0xff]  ;;  %v1952_v5 = vld [vmem:[%s2790_s0 + $0x110] sm:$0xff]  ;;  %v1957_v6 = vld [vmem:[%s2790_s0 + $0x128] sm:$0xff] }
  0x19   :  { %145 = vmatprep.subr.mxu0 %v2797_v0  ;;  %v1964_v7 = vld [vmem:[%s2790_s0 + $0x120] sm:$0xff]  ;;  %v1969_v8 = vld [vmem:[%s2790_s0 + $0x138] sm:$0xff]  ;;  %v1976_v9 = vld [vmem:[%s2790_s0 + $0x130] sm:$0xff] }
  0x1a   :  { %146 = vmatpush1.msra.mxu0 %v1655_v14  ;;  %v1981_v10 = vld [vmem:[%s2790_s0 + $0x148] sm:$0xff]  ;;  %v2089_v11 = vld [vmem:[%s2790_s0 + $0x1d8] sm:$0xff]  ;;  %v2096_v12 = vld [vmem:[%s2790_s0 + $0x1d0] sm:$0xff] }
  0x1b   :  { %147 = vmatprep.subr.mxu0 %v2797_v0  ;;  %2869 = vst [vmem:[#allocation26_spill] sm:$0xff] %v2089_v11  ;;  %2870 = vst [vmem:[#allocation27_spill] sm:$0xff] %v2096_v12  ;;  %v2101_v13 = vld [vmem:[%s2790_s0 + $0x1e8] sm:$0xff]  ;;  %v2108_v14 = vld [vmem:[%s2790_s0 + $0x1e0] sm:$0xff] }
  0x1c   :  { %148 = vmatpush1.msra.mxu0 %v1662_v15  ;;  %2871 = vst [vmem:[#allocation28_spill] sm:$0xff] %v2101_v13  ;;  %2872 = vst [vmem:[#allocation29_spill] sm:$0xff] %v2108_v14  ;;  %v2113_v15 = vld [vmem:[%s2790_s0 + $0x1f8] sm:$0xff] }
  0x1d   :  { %149 = vmatprep.subr.mxu0 %v2797_v0  ;;  %2873 = vst [vmem:[#allocation30_spill] sm:$0xff] %v2113_v15 }
  0x1e   :  { %150 = vmatpush1.msra.mxu0 %v1669_v16  ;;  %v2120_v16 = vld [vmem:[%s2790_s0 + $0x1f0] sm:$0xff] }
  0x1f   :  { %151 = vmatprep.subr.mxu0 %v2797_v0  ;;  %2874 = vst [vmem:[#allocation31_spill] sm:$0xff] %v2120_v16 }
  0x20   :  { %152 = vmatpush1.msra.mxu0 %v1676_v17 }
  0x21   :  { %153 = vmatprep.subr.mxu0 %v2797_v0 }
  0x22   :  { %154 = vmatpush2.msra.mxu0 %v56_v18  ;;  %v1988_v18 = vld [vmem:[%s2790_s0 + $0x140] sm:$0xff] }
  0x23   :  { %155 = vmatprep.subr.mxu0 %v2797_v0  ;;  %2852 = vst [vmem:[#allocation9_spill] sm:$0xff] %v1988_v18 }
  0x24   :  { %156 = vmatpush2.msra.mxu0 %v55_v19  ;;  %v1993_v19 = vld [vmem:[%s2790_s0 + $0x158] sm:$0xff] }
  0x25   :  { %157 = vmatprep.subr.mxu0 %v2797_v0  ;;  %2853 = vst [vmem:[#allocation10_spill] sm:$0xff] %v1993_v19 }
  0x26   :  { %158 = vmatpush2.msra.mxu0 %v54_v20  ;;  %v2000_v20 = vld [vmem:[%s2790_s0 + $0x150] sm:$0xff] }
  0x27   :  { %159 = vmatprep.subr.mxu0 %v2797_v0  ;;  %2854 = vst [vmem:[#allocation11_spill] sm:$0xff] %v2000_v20 }
  0x28   :  { %160 = vmatpush2.msra.mxu0 %v53_v21  ;;  %v2005_v21 = vld [vmem:[%s2790_s0 + $0x168] sm:$0xff] }
  0x29   :  { %161 = vmatprep.subr.mxu0 %v2797_v0  ;;  %2855 = vst [vmem:[#allocation12_spill] sm:$0xff] %v2005_v21 }
  0x2a   :  { %162 = vmatpush2.msra.mxu0 %v52_v22  ;;  %v2012_v22 = vld [vmem:[%s2790_s0 + $0x160] sm:$0xff] }
  0x2b   :  { %163 = vmatprep.subr.mxu0 %v2797_v0  ;;  %2856 = vst [vmem:[#allocation13_spill] sm:$0xff] %v2012_v22 }
  0x2c   :  { %164 = vmatpush2.msra.mxu0 %v51_v23  ;;  %v2017_v23 = vld [vmem:[%s2790_s0 + $0x178] sm:$0xff] }
  0x2d   :  { %165 = vmatprep.subr.mxu0 %v2797_v0  ;;  %2857 = vst [vmem:[#allocation14_spill] sm:$0xff] %v2017_v23 }
  0x2e   :  { %166 = vmatpush2.msra.mxu0 %v50_v24  ;;  %v2024_v24 = vld [vmem:[%s2790_s0 + $0x170] sm:$0xff] }
  0x2f   :  { %167 = vmatprep.subr.mxu0 %v2797_v0  ;;  %2858 = vst [vmem:[#allocation15_spill] sm:$0xff] %v2024_v24 }
  0x30   :  { %168 = vmatpush2.msra.mxu0 %v49_v25  ;;  %v2029_v25 = vld [vmem:[%s2790_s0 + $0x188] sm:$0xff] }
  0x31   :  { %169 = vmatprep.subr.mxu0 %v2797_v0  ;;  %2859 = vst [vmem:[#allocation16_spill] sm:$0xff] %v2029_v25 }
  0x32   :  { %170 = vmatpush2.msra.mxu0 %v48_v26  ;;  %v2036_v26 = vld [vmem:[%s2790_s0 + $0x180] sm:$0xff] }
  0x33   :  { %171 = vmatprep.subr.mxu0 %v2797_v0  ;;  %2860 = vst [vmem:[#allocation17_spill] sm:$0xff] %v2036_v26 }
  0x34   :  { %172 = vmatpush2.msra.mxu0 %v47_v27  ;;  %v2041_v27 = vld [vmem:[%s2790_s0 + $0x198] sm:$0xff] }
  0x35   :  { %173 = vmatprep.subr.mxu0 %v2797_v0  ;;  %2861 = vst [vmem:[#allocation18_spill] sm:$0xff] %v2041_v27 }
  0x36   :  { %174 = vmatpush2.msra.mxu0 %v46_v28  ;;  %v2048_v28 = vld [vmem:[%s2790_s0 + $0x190] sm:$0xff] }
  0x37   :  { %175 = vmatprep.subr.mxu0 %v2797_v0  ;;  %2862 = vst [vmem:[#allocation19_spill] sm:$0xff] %v2048_v28 }
  0x38   :  { %176 = vmatpush2.msra.mxu0 %v45_v29  ;;  %v2053_v29 = vld [vmem:[%s2790_s0 + $0x1a8] sm:$0xff] }
  0x39   :  { %177 = vmatprep.subr.mxu0 %v2797_v0  ;;  %2863 = vst [vmem:[#allocation20_spill] sm:$0xff] %v2053_v29 }
  0x3a   :  { %178 = vmatpush2.msra.mxu0 %v44_v30  ;;  %v2060_v30 = vld [vmem:[%s2790_s0 + $0x1a0] sm:$0xff] }
  0x3b   :  { %179 = vmatprep.subr.mxu0 %v2797_v0  ;;  %2864 = vst [vmem:[#allocation21_spill] sm:$0xff] %v2060_v30 }
  0x3c   :  { %180 = vmatpush2.msra.mxu0 %v43_v31  ;;  %v2065_v31 = vld [vmem:[%s2790_s0 + $0x1b8] sm:$0xff] }
  0x3d   :  { %181 = vmatprep.subr.mxu0 %v2797_v0  ;;  %2865 = vst [vmem:[#allocation22_spill] sm:$0xff] %v2065_v31 }
  0x3e   :  { %182 = vmatpush2.msra.mxu0 %v42_v32  ;;  %v2072_v32 = vld [vmem:[%s2790_s0 + $0x1b0] sm:$0xff] }
  0x3f   :  { %183 = vmatprep.subr.mxu0 %v2797_v0  ;;  %2866 = vst [vmem:[#allocation23_spill] sm:$0xff] %v2072_v32  ;;  %v2084_v0 = vld [vmem:[%s2790_s0 + $0x1c0] sm:$0xff] }
  0x40   :  { %184 = vmatpush2.msra.mxu0 %v41_v33  ;;  %v2077_v33 = vld [vmem:[%s2790_s0 + $0x1c8] sm:$0xff]  ;;  %2868 = vst [vmem:[#allocation25_spill] sm:$0xff] %v2084_v0 }
  0x41   :  { %186 = vmatmul.mubr.f32.vlgmr.msra.gmra.mxu0 %v1747_v34  ;;  %2867 = vst [vmem:[#allocation24_spill] sm:$0xff] %v2077_v33 }
  0x42   :  { %190 = vmatprep.mubr.f32.mxu0 %v1753_v35 }
  0x45   :  { %191 = vmatmul.mubr.f32.gmra.mxu0 %v1760_v36 }
  0x46   :  { %195 = vmatprep.mubr.f32.mxu0 %v1765_v37 }
  0x49   :  { %196 = vmatmul.mubr.f32.gmra.mxu0 %v1772_v38 }
  0x4a   :  { %200 = vmatprep.mubr.f32.mxu0 %v1777_v39 }
  0x4d   :  { %201 = vmatmul.mubr.f32.gmra.mxu0 %v1784_v40 }
  0x4e   :  { %205 = vmatprep.mubr.f32.mxu0 %v1789_v41 }
  0x51   :  { %206 = vmatmul.mubr.f32.gmra.mxu0 %v1796_v42 }
  0x52   :  { %210 = vmatprep.mubr.f32.mxu0 %v1801_v43 }
  0x55   :  { %211 = vmatmul.mubr.f32.gmra.mxu0 %v1808_v44 }
  0x56   :  { %215 = vmatprep.mubr.f32.mxu0 %v1813_v45 }
  0x59   :  { %216 = vmatmul.mubr.f32.gmra.mxu0 %v1820_v46 }
  0x5a   :  { %220 = vmatprep.mubr.f32.mxu0 %v1825_v47 }
  0x5d   :  { %221 = vmatmul.mubr.f32.gmra.mxu0 %v1832_v48 }
  0x5e   :  { %225 = vmatprep.mubr.f32.mxu0 %v1837_v49 }
  0x61   :  { %226 = vmatmul.mubr.f32.gmra.mxu0 %v1844_v50 }
  0x62   :  { %230 = vmatprep.mubr.f32.mxu0 %v1849_v51 }
  0x65   :  { %231 = vmatmul.mubr.f32.gmra.mxu0 %v1856_v52 }
  0x66   :  { %235 = vmatprep.mubr.f32.mxu0 %v1861_v53 }
  0x69   :  { %236 = vmatmul.mubr.f32.gmra.mxu0 %v1868_v54 }
  0x6a   :  { %240 = vmatprep.mubr.f32.mxu0 %v1873_v55 }
  0x6d   :  { %241 = vmatmul.mubr.f32.gmra.mxu0 %v1880_v56 }
  0x6e   :  { %245 = vmatprep.mubr.f32.mxu0 %v1885_v57 }
  0x71   :  { %246 = vmatmul.mubr.f32.gmra.mxu0 %v1892_v58 }
  0x72   :  { %250 = vmatprep.mubr.f32.mxu0 %v1897_v59 }
  0x75   :  { %251 = vmatmul.mubr.f32.gmra.mxu0 %v1904_v60 }
  0x76   :  { %255 = vmatprep.mubr.f32.mxu0 %v1909_v61 }
  0x79   :  { %256 = vmatmul.mubr.f32.gmra.mxu0 %v1916_v62 }
  0x7a   :  { %260 = vmatprep.mubr.f32.mxu0 %v1921_v63 }
  0x7d   :  { %261 = vmatmul.mubr.f32.gmra.mxu0 %v1928_v1 }
  0x7e   :  { %265 = vmatprep.mubr.f32.mxu0 %v1933_v2 }
  0x81   :  { %266 = vmatmul.mubr.f32.gmra.mxu0 %v1940_v3 }
  0x82   :  { %270 = vmatprep.mubr.f32.mxu0 %v1945_v4 }
  0x85   :  { %271 = vmatmul.mubr.f32.gmra.mxu0 %v1952_v5 }
  0x86   :  { %275 = vmatprep.mubr.f32.mxu0 %v1957_v6 }
  0x89   :  { %276 = vmatmul.mubr.f32.gmra.mxu0 %v1964_v7 }
  0x8a   :  { %280 = vmatprep.mubr.f32.mxu0 %v1969_v8 }
  0x8d   :  { %281 = vmatmul.mubr.f32.gmra.mxu0 %v1976_v9 }
  0x8e   :  { %285 = vmatprep.mubr.f32.mxu0 %v1981_v10 }
  0x91   :  { %286 = vmatmul.mubr.f32.gmra.mxu0 %v1988_v18 }
  0x92   :  { %290 = vmatprep.mubr.f32.mxu0 %v1993_v19 }
  0x95   :  { %291 = vmatmul.mubr.f32.gmra.mxu0 %v2000_v20 }
  0x96   :  { %295 = vmatprep.mubr.f32.mxu0 %v2005_v21 }
  0x99   :  { %296 = vmatmul.mubr.f32.gmra.mxu0 %v2012_v22 }
  0x9a   :  { %300 = vmatprep.mubr.f32.mxu0 %v2017_v23 }
  0x9d   :  { %301 = vmatmul.mubr.f32.gmra.mxu0 %v2024_v24 }
  0x9e   :  { %305 = vmatprep.mubr.f32.mxu0 %v2029_v25 }
  0xa1   :  { %306 = vmatmul.mubr.f32.gmra.mxu0 %v2036_v26 }
  0xa2   :  { %310 = vmatprep.mubr.f32.mxu0 %v2041_v27 }
  0xa5   :  { %311 = vmatmul.mubr.f32.gmra.mxu0 %v2048_v28 }
  0xa6   :  { %315 = vmatprep.mubr.f32.mxu0 %v2053_v29 }
  0xa9   :  { %316 = vmatmul.mubr.f32.gmra.mxu0 %v2060_v30 }
  0xaa   :  { %320 = vmatprep.mubr.f32.mxu0 %v2065_v31 }
  0xad   :  { %321 = vmatmul.mubr.f32.gmra.mxu0 %v2072_v32 }
  0xae   :  { %325 = vmatprep.mubr.f32.mxu0 %v2077_v33 }
  0xb1   :  { %326 = vmatmul.mubr.f32.gmra.mxu0 %v2084_v0 }
  0xb2   :  { %330 = vmatprep.mubr.f32.mxu0 %v2089_v11 }
  0xb5   :  { %331 = vmatmul.mubr.f32.gmra.mxu0 %v2096_v12 }
  0xb6   :  { %335 = vmatprep.mubr.f32.mxu0 %v2101_v13 }
  0xb9   :  { %336 = vmatmul.mubr.f32.gmra.mxu0 %v2108_v14 }
  0xba   :  { %340 = vmatprep.mubr.f32.mxu0 %v2113_v15 }
  0xbd   :  { %341 = vmatmul.mubr.f32.gmra.mxu0 %v2120_v16 }
 0x101   :  { %v2123_v17 = vpop.f32.mrf.mxu0 }
 0x102   :  { %2875 = vst [vmem:[#allocation32_spill] sm:$0xff] %v2123_v17 }
 0x103   :  { %v189_v13 = vpop.f32.mrf.mxu0 }
 0x105   :  { %v2125_v12 = vpop.f32.mrf.mxu0 }
 0x106   :  { %2876 = vst [vmem:[#allocation33_spill] sm:$0xff] %v2125_v12 }
 0x107   :  { %v194_v11 = vpop.f32.mrf.mxu0 }
 0x109   :  { %v2127_v0 = vpop.f32.mrf.mxu0 }
 0x10a   :  { %2877 = vst [vmem:[#allocation34_spill] sm:$0xff] %v2127_v0 }
 0x10b   :  { %v199_v33 = vpop.f32.mrf.mxu0 }
 0x10d   :  { %v2129_v32 = vpop.f32.mrf.mxu0 }
 0x10e   :  { %2878 = vst [vmem:[#allocation35_spill] sm:$0xff] %v2129_v32 }
 0x10f   :  { %v204_v14 = vpop.f32.mrf.mxu0 }
 0x111   :  { %v2131_v15 = vpop.f32.mrf.mxu0 }
 0x112   :  { %2879 = vst [vmem:[#allocation36_spill] sm:$0xff] %v2131_v15 }
 0x113   :  { %v209_v31 = vpop.f32.mrf.mxu0 }
 0x115   :  { %v2133_v30 = vpop.f32.mrf.mxu0 }
 0x116   :  { %2880 = vst [vmem:[#allocation37_spill] sm:$0xff] %v2133_v30 }
 0x117   :  { %v214_v29 = vpop.f32.mrf.mxu0 }
 0x119   :  { %v2135_v28 = vpop.f32.mrf.mxu0 }
 0x11a   :  { %2881 = vst [vmem:[#allocation38_spill] sm:$0xff] %v2135_v28 }
 0x11b   :  { %v219_v16 = vpop.f32.mrf.mxu0 }
 0x11d   :  { %v2137_v27 = vpop.f32.mrf.mxu0 }
 0x11e   :  { %2882 = vst [vmem:[#allocation39_spill] sm:$0xff] %v2137_v27 }
 0x11f   :  { %v224_v13 = vpop.f32.mrf.mxu0 }
 0x121   :  { %v2139_v26 = vpop.f32.mrf.mxu0 }
 0x122   :  { %2883 = vst [vmem:[#allocation40_spill] sm:$0xff] %v2139_v26 }
 0x123   :  { %v229_v11 = vpop.f32.mrf.mxu0 }
 0x125   :  { %v2141_v25 = vpop.f32.mrf.mxu0 }
 0x126   :  { %2884 = vst [vmem:[#allocation41_spill] sm:$0xff] %v2141_v25 }
 0x127   :  { %v234_v33 = vpop.f32.mrf.mxu0 }
 0x128   :  { %v2891_v33 = vmov 0.0  }
 0x129   :  { %v2143_v24 = vpop.f32.mrf.mxu0 }
 0x12a   :  { %2885 = vst [vmem:[#allocation42_spill] sm:$0xff] %v2143_v24 }
 0x12b   :  { %v239_v14 = vpop.f32.mrf.mxu0 }
 0x12d   :  { %v2145_v23 = vpop.f32.mrf.mxu0 }
 0x12e   :  { %2886 = vst [vmem:[#allocation43_spill] sm:$0xff] %v2145_v23 }
 0x12f   :  { %v244_v31 = vpop.f32.mrf.mxu0 }
 0x131   :  { %v2147_v22 = vpop.f32.mrf.mxu0 }
 0x132   :  { %2887 = vst [vmem:[#allocation44_spill] sm:$0xff] %v2147_v22 }
 0x133   :  { %v249_v29 = vpop.f32.mrf.mxu0 }
 0x135   :  { %v2149_v21 = vpop.f32.mrf.mxu0 }
 0x136   :  { %2888 = vst [vmem:[#allocation45_spill] sm:$0xff] %v2149_v21 }
 0x137   :  { %v254_v16 = vpop.f32.mrf.mxu0 }
 0x139   :  { %v2151_v20 = vpop.f32.mrf.mxu0 }
 0x13a   :  { %2889 = vst [vmem:[#allocation46_spill] sm:$0xff] %v2151_v20 }
 0x13b   :  { %v259_v13 = vpop.f32.mrf.mxu0 }
 0x13d   :  { %v2153_v19 = vpop.f32.mrf.mxu0 }
 0x13e   :  { %2890 = vst [vmem:[#allocation47_spill] sm:$0xff] %v2153_v19  ;;  %379 = vmatpush1.msra.mxu1 %v2153_v19 }
 0x13f   :  { %v264_v11 = vpop.f32.mrf.mxu0  ;;  %380 = vmatprep.subr.mxu1 %v2891_v33 }
 0x140   :  { %381 = vmatpush1.msra.mxu1 %v2151_v20 }
 0x141   :  { %v2158_v14 = vpop.f32.mrf.mxu0  ;;  %382 = vmatprep.subr.mxu1 %v2891_v33 }
 0x142   :  { %383 = vmatpush1.msra.mxu1 %v2149_v21 }
 0x143   :  { %v269_v31 = vpop.f32.mrf.mxu0  ;;  %384 = vmatprep.subr.mxu1 %v2891_v33 }
 0x144   :  { %385 = vmatpush1.msra.mxu1 %v2147_v22 }
 0x145   :  { %v2164_v29 = vpop.f32.mrf.mxu0  ;;  %386 = vmatprep.subr.mxu1 %v2891_v33 }
 0x146   :  { %387 = vmatpush1.msra.mxu1 %v2145_v23 }
 0x147   :  { %v274_v16 = vpop.f32.mrf.mxu0  ;;  %388 = vmatprep.subr.mxu1 %v2891_v33 }
 0x148   :  { %389 = vmatpush1.msra.mxu1 %v2143_v24 }
 0x149   :  { %v2170_v13 = vpop.f32.mrf.mxu0  ;;  %390 = vmatprep.subr.mxu1 %v2891_v33 }
 0x14a   :  { %391 = vmatpush1.msra.mxu1 %v2141_v25 }
 0x14b   :  { %v279_v11 = vpop.f32.mrf.mxu0  ;;  %392 = vmatprep.subr.mxu1 %v2891_v33 }
 0x14c   :  { %393 = vmatpush1.msra.mxu1 %v2139_v26 }
 0x14d   :  { %v2176_v31 = vpop.f32.mrf.mxu0  ;;  %394 = vmatprep.subr.mxu1 %v2891_v33 }
 0x14e   :  { %395 = vmatpush1.msra.mxu1 %v2137_v27 }
 0x14f   :  { %v284_v16 = vpop.f32.mrf.mxu0  ;;  %396 = vmatprep.subr.mxu1 %v2891_v33 }
 0x150   :  { %397 = vmatpush1.msra.mxu1 %v2135_v28 }
 0x151   :  { %v2182_v19 = vpop.f32.mrf.mxu0  ;;  %398 = vmatprep.subr.mxu1 %v2891_v33 }
 0x152   :  { %399 = vmatpush1.msra.mxu1 %v2133_v30 }
 0x153   :  { %v289_v11 = vpop.f32.mrf.mxu0  ;;  %400 = vmatprep.subr.mxu1 %v2891_v33 }
 0x154   :  { %401 = vmatpush1.msra.mxu1 %v2131_v15 }
 0x155   :  { %v2188_v20 = vpop.f32.mrf.mxu0  ;;  %402 = vmatprep.subr.mxu1 %v2891_v33 }
 0x156   :  { %403 = vmatpush1.msra.mxu1 %v2129_v32 }
 0x157   :  { %v294_v16 = vpop.f32.mrf.mxu0  ;;  %404 = vmatprep.subr.mxu1 %v2891_v33 }
 0x158   :  { %405 = vmatpush1.msra.mxu1 %v2127_v0 }
 0x159   :  { %v2194_v21 = vpop.f32.mrf.mxu0  ;;  %406 = vmatprep.subr.mxu1 %v2891_v33 }
 0x15a   :  { %407 = vmatpush1.msra.mxu1 %v2125_v12 }
 0x15b   :  { %v299_v11 = vpop.f32.mrf.mxu0  ;;  %408 = vmatprep.subr.mxu1 %v2891_v33 }
 0x15c   :  { %409 = vmatpush1.msra.mxu1 %v2123_v17 }
 0x15d   :  { %v2200_v22 = vpop.f32.mrf.mxu0  ;;  %410 = vmatprep.subr.mxu1 %v2891_v33 }
 0x15f   :  { %v304_v16 = vpop.f32.mrf.mxu0 }
 0x161   :  { %v2203_v23 = vpop.f32.mrf.mxu0 }
 0x163   :  { %v309_v24 = vpop.f32.mrf.mxu0 }
 0x165   :  { %v2205_v25 = vpop.f32.mrf.mxu0 }
 0x167   :  { %v314_v26 = vpop.f32.mrf.mxu0 }
 0x168   :  { %v713_v26 = vld [vmem:[%s2791_s2 + $0x70] sm:$0xff] }
 0x169   :  { %v2207_v27 = vpop.f32.mrf.mxu0 }
 0x16b   :  { %v319_v28 = vpop.f32.mrf.mxu0 }
 0x16c   :  { %v712_v28 = vld [vmem:[%s2791_s2 + $0x68] sm:$0xff] }
 0x16d   :  { %v2209_v30 = vpop.f32.mrf.mxu0 }
 0x16f   :  { %v324_v11 = vpop.f32.mrf.mxu0 }
 0x170   :  { %v994_v11 = vld [vmem:[%s2792_s4 + $0x78] sm:$0xff] }
 0x171   :  { %v2211_v15 = vpop.f32.mrf.mxu0 }
 0x173   :  { %v329_v32 = vpop.f32.mrf.mxu0 }
 0x174   :  { %v711_v32 = vld [vmem:[%s2791_s2 + $0x60] sm:$0xff] }
 0x175   :  { %v2213_v0 = vpop.f32.mrf.mxu0 }
 0x177   :  { %v334_v12 = vpop.f32.mrf.mxu0 }
 0x178   :  { %v714_v12 = vld [vmem:[%s2791_s2 + $0x78] sm:$0xff] }
 0x179   :  { %v2215_v17 = vpop.f32.mrf.mxu0  ;;  %1365 = vmatprep.subr.mxu0 %v714_v12 }
 0x17a   :  { %1366 = vmatpush3.msra.mxu0 %v714_v12  ;;  %v2918_v12 = vld [vmem:[#allocation33_spill] sm:$0xff] }
 0x17b   :  { %v339_v16 = vpop.f32.mrf.mxu0  ;;  %1367 = vmatprep.subr.mxu0 %v713_v26 }
 0x17c   :  { %1368 = vmatpush3.msra.mxu0 %v713_v26  ;;  %v993_v16 = vld [vmem:[%s2792_s4 + $0x70] sm:$0xff] }
 0x17d   :  { %v2217_v18 = vpop.f32.mrf.mxu0  ;;  %1369 = vmatprep.subr.mxu0 %v712_v28 }
 0x17e   :  { %411 = vmatpush2.msra.mxu1 %v2217_v18  ;;  %1370 = vmatpush3.msra.mxu0 %v712_v28 }
 0x17f   :  { %v344_v24 = vpop.f32.mrf.mxu0  ;;  %412 = vmatprep.subr.mxu1 %v2891_v33  ;;  %1371 = vmatprep.subr.mxu0 %v711_v32 }
 0x180   :  { %413 = vmatpush2.msra.mxu1 %v2215_v17  ;;  %1372 = vmatpush3.msra.mxu0 %v711_v32  ;;  %v2917_v24 = vld [vmem:[#allocation7_spill] sm:$0xff] }
 0x181   :  { %414 = vmatprep.subr.mxu1 %v2891_v33  ;;  %v347_v26 = vadd.f32 %v2918_v12, %v2917_v24 }
 0x182   :  { %415 = vmatpush2.msra.mxu1 %v2213_v0 }
 0x183   :  { %416 = vmatprep.subr.mxu1 %v2891_v33 }
 0x184   :  { %417 = vmatpush2.msra.mxu1 %v2211_v15 }
 0x185   :  { %418 = vmatprep.subr.mxu1 %v2891_v33 }
 0x186   :  { %419 = vmatpush2.msra.mxu1 %v2209_v30 }
 0x187   :  { %420 = vmatprep.subr.mxu1 %v2891_v33 }
 0x188   :  { %421 = vmatpush2.msra.mxu1 %v2207_v27 }
 0x189   :  { %422 = vmatprep.subr.mxu1 %v2891_v33 }
 0x18a   :  { %423 = vmatpush2.msra.mxu1 %v2205_v25 }
 0x18b   :  { %424 = vmatprep.subr.mxu1 %v2891_v33 }
 0x18c   :  { %425 = vmatpush2.msra.mxu1 %v2203_v23 }
 0x18d   :  { %426 = vmatprep.subr.mxu1 %v2891_v33 }
 0x18e   :  { %427 = vmatpush2.msra.mxu1 %v2200_v22 }
 0x18f   :  { %428 = vmatprep.subr.mxu1 %v2891_v33 }
 0x190   :  { %429 = vmatpush2.msra.mxu1 %v2194_v21 }
 0x191   :  { %430 = vmatprep.subr.mxu1 %v2891_v33 }
 0x192   :  { %431 = vmatpush2.msra.mxu1 %v2188_v20 }
 0x193   :  { %432 = vmatprep.subr.mxu1 %v2891_v33 }
 0x194   :  { %433 = vmatpush2.msra.mxu1 %v2182_v19 }
 0x195   :  { %434 = vmatprep.subr.mxu1 %v2891_v33 }
 0x196   :  { %435 = vmatpush2.msra.mxu1 %v2176_v31 }
 0x197   :  { %436 = vmatprep.subr.mxu1 %v2891_v33 }
 0x198   :  { %437 = vmatpush2.msra.mxu1 %v2170_v13 }
 0x199   :  { %438 = vmatprep.subr.mxu1 %v2891_v33 }
 0x19a   :  { %439 = vmatpush2.msra.mxu1 %v2164_v29 }
 0x19b   :  { %440 = vmatprep.subr.mxu1 %v2891_v33  ;;  %v710_v33 = vld [vmem:[%s2791_s2 + $0x58] sm:$0xff] }
 0x19c   :  { %441 = vmatpush2.msra.mxu1 %v2158_v14  ;;  %1373 = vmatprep.subr.mxu0 %v710_v33 }
 0x19d   :  { %443 = vmatmul.mubr.f32.vlgmr.msra.gmra.mxu1 %v1747_v34  ;;  %v709_v34 = vld [vmem:[%s2791_s2 + $0x50] sm:$0xff]  ;;  %1374 = vmatpush3.msra.mxu0 %v710_v33  ;;  %v992_v33 = vld [vmem:[%s2792_s4 + $0x68] sm:$0xff] }
 0x19e   :  { %447 = vmatprep.mubr.f32.mxu1 %v1753_v35  ;;  %v708_v35 = vld [vmem:[%s2791_s2 + $0x48] sm:$0xff]  ;;  %1375 = vmatprep.subr.mxu0 %v709_v34 }
 0x19f   :  { %1376 = vmatpush3.msra.mxu0 %v709_v34  ;;  %1445 = vmatprep.subr.mxu1 %v994_v11 }
 0x1a0   :  { %1377 = vmatprep.subr.mxu0 %v708_v35  ;;  %1446 = vmatpush3.msra.mxu1 %v994_v11  ;;  %v2928_v11 = vld [vmem:[#allocation38_spill] sm:$0xff] }
 0x1a1   :  { %448 = vmatmul.mubr.f32.gmra.mxu1 %v1760_v36  ;;  %v707_v36 = vld [vmem:[%s2791_s2 + $0x40] sm:$0xff]  ;;  %1378 = vmatpush3.msra.mxu0 %v708_v35 }
 0x1a2   :  { %452 = vmatprep.mubr.f32.mxu1 %v1765_v37  ;;  %v706_v37 = vld [vmem:[%s2791_s2 + $0x38] sm:$0xff]  ;;  %1379 = vmatprep.subr.mxu0 %v707_v36 }
 0x1a3   :  { %1380 = vmatpush3.msra.mxu0 %v707_v36  ;;  %1447 = vmatprep.subr.mxu1 %v993_v16  ;;  %v991_v36 = vld [vmem:[%s2792_s4 + $0x60] sm:$0xff] }
 0x1a4   :  { %1381 = vmatprep.subr.mxu0 %v706_v37  ;;  %1448 = vmatpush3.msra.mxu1 %v993_v16 }
 0x1a5   :  { %453 = vmatmul.mubr.f32.gmra.mxu1 %v1772_v38  ;;  %v705_v38 = vld [vmem:[%s2791_s2 + $0x30] sm:$0xff]  ;;  %1382 = vmatpush3.msra.mxu0 %v706_v37  ;;  %v2919_v37 = vld [vmem:[#allocation6_spill] sm:$0xff] }
 0x1a6   :  { %457 = vmatprep.mubr.f32.mxu1 %v1777_v39  ;;  %v704_v39 = vld [vmem:[%s2791_s2 + $0x28] sm:$0xff]  ;;  %1383 = vmatprep.subr.mxu0 %v705_v38 }
 0x1a7   :  { %1384 = vmatpush3.msra.mxu0 %v705_v38  ;;  %v2920_v38 = vld [vmem:[#allocation34_spill] sm:$0xff]  ;;  %1449 = vmatprep.subr.mxu1 %v992_v33 }
 0x1a8   :  { %1385 = vmatprep.subr.mxu0 %v704_v39  ;;  %1450 = vmatpush3.msra.mxu1 %v992_v33  ;;  %v2929_v33 = vld [vmem:[#allocation39_spill] sm:$0xff] }
 0x1a9   :  { %458 = vmatmul.mubr.f32.gmra.mxu1 %v1784_v40  ;;  %v703_v40 = vld [vmem:[%s2791_s2 + $0x20] sm:$0xff]  ;;  %1386 = vmatpush3.msra.mxu0 %v704_v39  ;;  %v348_v39 = vadd.f32 %v2920_v38, %v2919_v37 }
 0x1aa   :  { %462 = vmatprep.mubr.f32.mxu1 %v1789_v41  ;;  %1387 = vmatprep.subr.mxu0 %v703_v40  ;;  %v702_v41 = vld [vmem:[%s2791_s2 + $0x18] sm:$0xff] }
 0x1ab   :  { %1388 = vmatpush3.msra.mxu0 %v703_v40  ;;  %1451 = vmatprep.subr.mxu1 %v991_v36 }
 0x1ac   :  { %1389 = vmatprep.subr.mxu0 %v702_v41  ;;  %1452 = vmatpush3.msra.mxu1 %v991_v36 }
 0x1ad   :  { %463 = vmatmul.mubr.f32.gmra.mxu1 %v1796_v42  ;;  %1390 = vmatpush3.msra.mxu0 %v702_v41  ;;  %v701_v42 = vld [vmem:[%s2791_s2 + $0x10] sm:$0xff] }
 0x1ae   :  { %467 = vmatprep.mubr.f32.mxu1 %v1801_v43  ;;  %1391 = vmatprep.subr.mxu0 %v701_v42  ;;  %v700_v43 = vld [vmem:[%s2791_s2 + $0x8] sm:$0xff] }
 0x1af   :  { %1392 = vmatpush3.msra.mxu0 %v701_v42  ;;  %v990_v42 = vld [vmem:[%s2792_s4 + $0x58] sm:$0xff] }
 0x1b0   :  { %1393 = vmatprep.subr.mxu0 %v700_v43  ;;  %1453 = vmatprep.subr.mxu1 %v990_v42 }
 0x1b1   :  { %468 = vmatmul.mubr.f32.gmra.mxu1 %v1808_v44  ;;  %1394 = vmatpush3.msra.mxu0 %v700_v43  ;;  %v699_v44 = vld [vmem:[%s2791_s2] sm:$0xff] }
 0x1b2   :  { %472 = vmatprep.mubr.f32.mxu1 %v1813_v45  ;;  %1395 = vmatprep.subr.mxu0 %v699_v44  ;;  %v2892_v45 = vld [vmem:[#allocation9_spill] sm:$0xff] }
 0x1b3   :  { %1396 = vmatpush3.msra.mxu0 %v699_v44  ;;  %1454 = vmatpush3.msra.mxu1 %v990_v42 }
 0x1b5   :  { %473 = vmatmul.mubr.f32.gmra.mxu1 %v1820_v46  ;;  %v2893_v46 = vld [vmem:[#allocation10_spill] sm:$0xff] }
 0x1b6   :  { %477 = vmatprep.mubr.f32.mxu1 %v1825_v47  ;;  %v2894_v47 = vld [vmem:[#allocation11_spill] sm:$0xff] }
 0x1b9   :  { %478 = vmatmul.mubr.f32.gmra.mxu1 %v1832_v48  ;;  %v2895_v48 = vld [vmem:[#allocation12_spill] sm:$0xff] }
 0x1ba   :  { %482 = vmatprep.mubr.f32.mxu1 %v1837_v49  ;;  %v2896_v49 = vld [vmem:[#allocation13_spill] sm:$0xff] }
 0x1bd   :  { %483 = vmatmul.mubr.f32.gmra.mxu1 %v1844_v50  ;;  %v2897_v50 = vld [vmem:[#allocation14_spill] sm:$0xff] }
 0x1be   :  { %487 = vmatprep.mubr.f32.mxu1 %v1849_v51  ;;  %v2898_v51 = vld [vmem:[#allocation15_spill] sm:$0xff] }
 0x1c1   :  { %488 = vmatmul.mubr.f32.gmra.mxu1 %v1856_v52  ;;  %v2899_v52 = vld [vmem:[#allocation16_spill] sm:$0xff] }
 0x1c2   :  { %492 = vmatprep.mubr.f32.mxu1 %v1861_v53  ;;  %v2900_v53 = vld [vmem:[#allocation17_spill] sm:$0xff] }
 0x1c5   :  { %493 = vmatmul.mubr.f32.gmra.mxu1 %v1868_v54  ;;  %v2901_v54 = vld [vmem:[#allocation18_spill] sm:$0xff] }
 0x1c6   :  { %497 = vmatprep.mubr.f32.mxu1 %v1873_v55  ;;  %v2902_v55 = vld [vmem:[#allocation19_spill] sm:$0xff] }
 0x1c9   :  { %498 = vmatmul.mubr.f32.gmra.mxu1 %v1880_v56  ;;  %v2903_v56 = vld [vmem:[#allocation20_spill] sm:$0xff] }
 0x1ca   :  { %502 = vmatprep.mubr.f32.mxu1 %v1885_v57  ;;  %v2904_v57 = vld [vmem:[#allocation21_spill] sm:$0xff] }
 0x1cd   :  { %503 = vmatmul.mubr.f32.gmra.mxu1 %v1892_v58  ;;  %v2905_v58 = vld [vmem:[#allocation22_spill] sm:$0xff] }
 0x1ce   :  { %507 = vmatprep.mubr.f32.mxu1 %v1897_v59  ;;  %v2906_v59 = vld [vmem:[#allocation23_spill] sm:$0xff] }
 0x1d1   :  { %508 = vmatmul.mubr.f32.gmra.mxu1 %v1904_v60  ;;  %v2907_v60 = vld [vmem:[#allocation24_spill] sm:$0xff] }
 0x1d2   :  { %512 = vmatprep.mubr.f32.mxu1 %v1909_v61  ;;  %v2908_v61 = vld [vmem:[#allocation25_spill] sm:$0xff] }
 0x1d5   :  { %513 = vmatmul.mubr.f32.gmra.mxu1 %v1916_v62  ;;  %v2909_v62 = vld [vmem:[#allocation26_spill] sm:$0xff] }
 0x1d6   :  { %517 = vmatprep.mubr.f32.mxu1 %v1921_v63  ;;  %v2910_v63 = vld [vmem:[#allocation27_spill] sm:$0xff] }
 0x1d9   :  { %518 = vmatmul.mubr.f32.gmra.mxu1 %v1928_v1  ;;  %v2911_v1 = vld [vmem:[#allocation28_spill] sm:$0xff] }
 0x1da   :  { %522 = vmatprep.mubr.f32.mxu1 %v1933_v2  ;;  %v2912_v2 = vld [vmem:[#allocation29_spill] sm:$0xff] }
 0x1dd   :  { %523 = vmatmul.mubr.f32.gmra.mxu1 %v1940_v3  ;;  %v2913_v3 = vld [vmem:[#allocation30_spill] sm:$0xff] }
 0x1de   :  { %527 = vmatprep.mubr.f32.mxu1 %v1945_v4  ;;  %v2914_v4 = vld [vmem:[#allocation31_spill] sm:$0xff] }
 0x1e1   :  { %528 = vmatmul.mubr.f32.gmra.mxu1 %v1952_v5  ;;  %v2915_v5 = vld [vmem:[#allocation8_spill] sm:$0xff] }
 0x1e2   :  { %532 = vmatprep.mubr.f32.mxu1 %v1957_v6  ;;  %v2916_v6 = vld [vmem:[#allocation32_spill] sm:$0xff] }
 0x1e5   :  { %533 = vmatmul.mubr.f32.gmra.mxu1 %v1964_v7  ;;  %v346_v7 = vadd.f32 %v2916_v6, %v2915_v5  ;;  %v984_v6 = vld [vmem:[%s2792_s4 + $0x28] sm:$0xff] }
 0x1e6   :  { %537 = vmatprep.mubr.f32.mxu1 %v1969_v8 }
 0x1e9   :  { %538 = vmatmul.mubr.f32.gmra.mxu1 %v1976_v9 }
 0x1ea   :  { %542 = vmatprep.mubr.f32.mxu1 %v1981_v10 }
 0x1ed   :  { %543 = vmatmul.mubr.f32.gmra.mxu1 %v2892_v45  ;;  %v989_v45 = vld [vmem:[%s2792_s4 + $0x50] sm:$0xff] }
 0x1ee   :  { %547 = vmatprep.mubr.f32.mxu1 %v2893_v46  ;;  %v2921_v46 = vld [vmem:[#allocation5_spill] sm:$0xff]  ;;  %1455 = vmatprep.subr.mxu1 %v989_v45 }
 0x1ef   :  { %1456 = vmatpush3.msra.mxu1 %v989_v45 }
 0x1f1   :  { %548 = vmatmul.mubr.f32.gmra.mxu1 %v2894_v47  ;;  %v2922_v47 = vld [vmem:[#allocation35_spill] sm:$0xff] }
 0x1f2   :  { %552 = vmatprep.mubr.f32.mxu1 %v2895_v48  ;;  %v349_v48 = vadd.f32 %v2922_v47, %v2921_v46  ;;  %v1528_v46 = vld [vmem:[%s2789_s1 + $0x48] sm:$0xff]  ;;  %v2931_v47 = vld [vmem:[#allocation41_spill] sm:$0xff] }
 0x1f5   :  { %553 = vmatmul.mubr.f32.gmra.mxu1 %v2896_v49 }
 0x1f6   :  { %557 = vmatprep.mubr.f32.mxu1 %v2897_v50 }
 0x1f9   :  { %558 = vmatmul.mubr.f32.gmra.mxu1 %v2898_v51  ;;  %v988_v51 = vld [vmem:[%s2792_s4 + $0x48] sm:$0xff] }
 0x1fa   :  { %562 = vmatprep.mubr.f32.mxu1 %v2899_v52  ;;  %1457 = vmatprep.subr.mxu1 %v988_v51 }
 0x1fb   :  { %1458 = vmatpush3.msra.mxu1 %v988_v51 }
 0x1fd   :  { %563 = vmatmul.mubr.f32.gmra.mxu1 %v2900_v53 }
 0x1fe   :  { %567 = vmatprep.mubr.f32.mxu1 %v2901_v54  ;;  %v987_v54 = vld [vmem:[%s2792_s4 + $0x40] sm:$0xff] }
 0x1ff   :  { %1459 = vmatprep.subr.mxu1 %v987_v54 }
 0x200   :  { %1460 = vmatpush3.msra.mxu1 %v987_v54  ;;  %v2932_v54 = vld [vmem:[#allocation42_spill] sm:$0xff] }
 0x201   :  { %568 = vmatmul.mubr.f32.gmra.mxu1 %v2902_v55  ;;  %v2923_v55 = vld [vmem:[#allocation4_spill] sm:$0xff] }
 0x202   :  { %572 = vmatprep.mubr.f32.mxu1 %v2903_v56  ;;  %v2924_v56 = vld [vmem:[#allocation36_spill] sm:$0xff] }
 0x205   :  { %573 = vmatmul.mubr.f32.gmra.mxu1 %v2904_v57  ;;  %v350_v57 = vadd.f32 %v2924_v56, %v2923_v55 }
 0x206   :  { %577 = vmatprep.mubr.f32.mxu1 %v2905_v58 }
 0x209   :  { %578 = vmatmul.mubr.f32.gmra.mxu1 %v2906_v59 }
 0x20a   :  { %582 = vmatprep.mubr.f32.mxu1 %v2907_v60  ;;  %v986_v60 = vld [vmem:[%s2792_s4 + $0x38] sm:$0xff] }
 0x20b   :  { %1461 = vmatprep.subr.mxu1 %v986_v60 }
 0x20c   :  { %1462 = vmatpush3.msra.mxu1 %v986_v60  ;;  %v1530_v60 = vld [vmem:[%s2789_s1 + $0x58] sm:$0xff] }
 0x20d   :  { %583 = vmatmul.mubr.f32.gmra.mxu1 %v2908_v61 }
 0x20e   :  { %587 = vmatprep.mubr.f32.mxu1 %v2909_v62 }
 0x211   :  { %588 = vmatmul.mubr.f32.gmra.mxu1 %v2910_v63  ;;  %v985_v63 = vld [vmem:[%s2792_s4 + $0x30] sm:$0xff] }
 0x212   :  { %592 = vmatprep.mubr.f32.mxu1 %v2911_v1  ;;  %v2925_v1 = vld [vmem:[#allocation3_spill] sm:$0xff]  ;;  %1463 = vmatprep.subr.mxu1 %v985_v63 }
 0x213   :  { %1464 = vmatpush3.msra.mxu1 %v985_v63 }
 0x214   :  { %1465 = vmatprep.subr.mxu1 %v984_v6 }
 0x215   :  { %593 = vmatmul.mubr.f32.gmra.mxu1 %v2912_v2  ;;  %v2926_v2 = vld [vmem:[#allocation37_spill] sm:$0xff] }
 0x216   :  { %597 = vmatprep.mubr.f32.mxu1 %v2913_v3  ;;  %v351_v3 = vadd.f32 %v2926_v2, %v2925_v1  ;;  %1466 = vmatpush3.msra.mxu1 %v984_v6 }
 0x219   :  { %598 = vmatmul.mubr.f32.gmra.mxu1 %v2914_v4 }
 0x25d   :  { %v444_v8 = vpop.f32.mrf.mxu1 }
 0x25e   :  { %v603_v9 = vadd.f32 %v444_v8, %v346_v7 }
 0x25f   :  { %v446_v10 = vpop.f32.mrf.mxu1 }
 0x260   :  { %v635_v28 = vmul.f32 0.33333334, %v603_v9  ;;  %v983_v9 = vld [vmem:[%s2792_s4 + $0x20] sm:$0xff] }
 0x261   :  { %v449_v32 = vpop.f32.mrf.mxu1  ;;  %v2927_v10 = vld [vmem:[#allocation2_spill] sm:$0xff]  ;;  %1467 = vmatprep.subr.mxu1 %v983_v9 }
 0x262   :  { %667 = vst [vmem:[%s2793_s6] sm:$0xff] %v635_v28  ;;  %v604_v34 = vadd.f32 %v449_v32, %v347_v26  ;;  %1397 = vmatprep.mubr.f32.mxu0 %v635_v28  ;;  %v352_v16 = vadd.f32 %v2928_v11, %v2927_v10  ;;  %1468 = vmatpush3.msra.mxu1 %v983_v9  ;;  %v1526_v32 = vld [vmem:[%s2789_s1 + $0x38] sm:$0xff]  ;;  %v1532_v11 = vld [vmem:[%s2789_s1 + $0x68] sm:$0xff] }
 0x263   :  { %v451_v35 = vpop.f32.mrf.mxu1 }
 0x264   :  { %v636_v40 = vmul.f32 0.33333334, %v604_v34  ;;  %v353_v34 = vadd.f32 %v1526_v32, %v2929_v33  ;;  %v1533_v33 = vld [vmem:[%s2789_s1 + $0x70] sm:$0xff] }
 0x265   :  { %v454_v41 = vpop.f32.mrf.mxu1 }
 0x266   :  { %668 = vst [vmem:[%s2793_s6 + $0x8] sm:$0xff] %v636_v40  ;;  %v605_v43 = vadd.f32 %v454_v41, %v348_v39  ;;  %1398 = vmatmul.mubr.f32.vlgmr.msra.gmra.mxu0 %v636_v40  ;;  %v1527_v39 = vld [vmem:[%s2789_s1 + $0x40] sm:$0xff]  ;;  %v2930_v40 = vld [vmem:[#allocation40_spill] sm:$0xff] }
 0x267   :  { %v456_v44 = vpop.f32.mrf.mxu1  ;;  %v354_v41 = vadd.f32 %v1527_v39, %v2930_v40  ;;  %v1534_v40 = vld [vmem:[%s2789_s1 + $0x78] sm:$0xff] }
 0x268   :  { %v637_v49 = vmul.f32 0.33333334, %v605_v43 }
 0x269   :  { %v459_v50 = vpop.f32.mrf.mxu1 }
 0x26a   :  { %669 = vst [vmem:[%s2793_s6 + $0x10] sm:$0xff] %v637_v49  ;;  %v606_v52 = vadd.f32 %v459_v50, %v349_v48  ;;  %1400 = vmatprep.mubr.f32.mxu0 %v637_v49  ;;  %v355_v48 = vadd.f32 %v1528_v46, %v2931_v47  ;;  %v1535_v47 = vld [vmem:[%s2789_s1 + $0x80] sm:$0xff] }
 0x26b   :  { %v461_v53 = vpop.f32.mrf.mxu1 }
 0x26c   :  { %v638_v58 = vmul.f32 0.33333334, %v606_v52  ;;  %v1529_v53 = vld [vmem:[%s2789_s1 + $0x50] sm:$0xff] }
 0x26d   :  { %v464_v59 = vpop.f32.mrf.mxu1  ;;  %v356_v55 = vadd.f32 %v1529_v53, %v2932_v54  ;;  %v1536_v53 = vld [vmem:[%s2789_s1 + $0x88] sm:$0xff] }
 0x26e   :  { %670 = vst [vmem:[%s2793_s6 + $0x18] sm:$0xff] %v638_v58  ;;  %v607_v61 = vadd.f32 %v464_v59, %v350_v57  ;;  %1401 = vmatmul.mubr.f32.gmra.mxu0 %v638_v58  ;;  %v363_v54 = vadd.f32 %v1536_v53, %v2164_v29  ;;  %v982_v29 = vld [vmem:[%s2792_s4 + $0x18] sm:$0xff] }
 0x26f   :  { %v466_v62 = vpop.f32.mrf.mxu1  ;;  %1469 = vmatprep.subr.mxu1 %v982_v29 }
 0x270   :  { %v639_v4 = vmul.f32 0.33333334, %v607_v61  ;;  %v2933_v61 = vld [vmem:[#allocation43_spill] sm:$0xff]  ;;  %1470 = vmatpush3.msra.mxu1 %v982_v29 }
 0x271   :  { %v469_v5 = vpop.f32.mrf.mxu1  ;;  %v357_v62 = vadd.f32 %v1530_v60, %v2933_v61 }
 0x272   :  { %671 = vst [vmem:[%s2793_s6 + $0x20] sm:$0xff] %v639_v4  ;;  %v608_v7 = vadd.f32 %v469_v5, %v351_v3  ;;  %1403 = vmatprep.mubr.f32.mxu0 %v639_v4  ;;  %v1531_v4 = vld [vmem:[%s2789_s1 + $0x60] sm:$0xff]  ;;  %v2934_v5 = vld [vmem:[#allocation44_spill] sm:$0xff] }
 0x273   :  { %v471_v8 = vpop.f32.mrf.mxu1  ;;  %v358_v6 = vadd.f32 %v1531_v4, %v2934_v5  ;;  %v980_v5 = vld [vmem:[%s2792_s4 + $0x8] sm:$0xff] }
 0x274   :  { %v640_v24 = vmul.f32 0.33333334, %v608_v7 }
 0x275   :  { %v474_v12 = vpop.f32.mrf.mxu1 }
 0x276   :  { %672 = vst [vmem:[%s2793_s6 + $0x28] sm:$0xff] %v640_v24  ;;  %v609_v26 = vadd.f32 %v474_v12, %v352_v16  ;;  %1404 = vmatmul.mubr.f32.gmra.mxu0 %v640_v24  ;;  %v2935_v16 = vld [vmem:[#allocation45_spill] sm:$0xff] }
 0x277   :  { %v476_v28 = vpop.f32.mrf.mxu1  ;;  %v359_v24 = vadd.f32 %v1532_v11, %v2935_v16 }
 0x278   :  { %v641_v35 = vmul.f32 0.33333334, %v609_v26 }
 0x279   :  { %v479_v36 = vpop.f32.mrf.mxu1 }
 0x27a   :  { %673 = vst [vmem:[%s2793_s6 + $0x30] sm:$0xff] %v641_v35  ;;  %v610_v37 = vadd.f32 %v479_v36, %v353_v34  ;;  %1406 = vmatprep.mubr.f32.mxu0 %v641_v35  ;;  %v2936_v34 = vld [vmem:[#allocation46_spill] sm:$0xff] }
 0x27b   :  { %v481_v38 = vpop.f32.mrf.mxu1  ;;  %v360_v35 = vadd.f32 %v1533_v33, %v2936_v34  ;;  %v1541_v34 = vld [vmem:[%s2789_s1 + $0xb0] sm:$0xff] }
 0x27c   :  { %v642_v42 = vmul.f32 0.33333334, %v610_v37 }
 0x27d   :  { %v484_v43 = vpop.f32.mrf.mxu1 }
 0x27e   :  { %674 = vst [vmem:[%s2793_s6 + $0x38] sm:$0xff] %v642_v42  ;;  %v611_v44 = vadd.f32 %v484_v43, %v354_v41  ;;  %1407 = vmatmul.mubr.f32.gmra.mxu0 %v642_v42  ;;  %v2937_v41 = vld [vmem:[#allocation47_spill] sm:$0xff] }
 0x27f   :  { %v486_v45 = vpop.f32.mrf.mxu1  ;;  %v361_v42 = vadd.f32 %v1534_v40, %v2937_v41 }
 0x280   :  { %v643_v49 = vmul.f32 0.33333334, %v611_v44 }
 0x281   :  { %v489_v50 = vpop.f32.mrf.mxu1 }
 0x282   :  { %675 = vst [vmem:[%s2793_s6 + $0x40] sm:$0xff] %v643_v49  ;;  %v612_v51 = vadd.f32 %v489_v50, %v355_v48  ;;  %1409 = vmatprep.mubr.f32.mxu0 %v643_v49  ;;  %v362_v48 = vadd.f32 %v1535_v47, %v2158_v14 }
 0x283   :  { %v491_v52 = vpop.f32.mrf.mxu1 }
 0x284   :  { %v644_v56 = vmul.f32 0.33333334, %v612_v51 }
 0x285   :  { %v494_v57 = vpop.f32.mrf.mxu1 }
 0x286   :  { %676 = vst [vmem:[%s2793_s6 + $0x48] sm:$0xff] %v644_v56  ;;  %v613_v58 = vadd.f32 %v494_v57, %v356_v55  ;;  %1410 = vmatmul.mubr.f32.gmra.mxu0 %v644_v56 }
 0x287   :  { %v496_v59 = vpop.f32.mrf.mxu1 }
 0x288   :  { %v645_v63 = vmul.f32 0.33333334, %v613_v58  ;;  %v1537_v58 = vld [vmem:[%s2789_s1 + $0x90] sm:$0xff] }
 0x289   :  { %v499_v1 = vpop.f32.mrf.mxu1  ;;  %v364_v59 = vadd.f32 %v1537_v58, %v2170_v13  ;;  %v1538_v13 = vld [vmem:[%s2789_s1 + $0x98] sm:$0xff] }
 0x28a   :  { %677 = vst [vmem:[%s2793_s6 + $0x50] sm:$0xff] %v645_v63  ;;  %v614_v2 = vadd.f32 %v499_v1, %v357_v62  ;;  %1412 = vmatprep.mubr.f32.mxu0 %v645_v63  ;;  %v981_v1 = vld [vmem:[%s2792_s4 + $0x10] sm:$0xff]  ;;  %v1546_v58 = vld [vmem:[%s2789_s1 + $0xd8] sm:$0xff] }
 0x28b   :  { %v501_v3 = vpop.f32.mrf.mxu1  ;;  %1471 = vmatprep.subr.mxu1 %v981_v1 }
 0x28c   :  { %v646_v7 = vmul.f32 0.33333334, %v614_v2  ;;  %v365_v2 = vadd.f32 %v1538_v13, %v2176_v31  ;;  %1472 = vmatpush3.msra.mxu1 %v981_v1  ;;  %v979_v31 = vld [vmem:[%s2792_s4] sm:$0xff] }
 0x28d   :  { %v504_v8 = vpop.f32.mrf.mxu1  ;;  %1473 = vmatprep.subr.mxu1 %v980_v5 }
 0x28e   :  { %678 = vst [vmem:[%s2793_s6 + $0x58] sm:$0xff] %v646_v7  ;;  %v615_v9 = vadd.f32 %v504_v8, %v358_v6  ;;  %1413 = vmatmul.mubr.f32.gmra.mxu0 %v646_v7  ;;  %1474 = vmatpush3.msra.mxu1 %v980_v5  ;;  %v1539_v8 = vld [vmem:[%s2789_s1 + $0xa0] sm:$0xff] }
 0x28f   :  { %v506_v10 = vpop.f32.mrf.mxu1  ;;  %1475 = vmatprep.subr.mxu1 %v979_v31 }
 0x290   :  { %v647_v12 = vmul.f32 0.33333334, %v615_v9  ;;  %v366_v9 = vadd.f32 %v1539_v8, %v2182_v19  ;;  %1476 = vmatpush3.msra.mxu1 %v979_v31  ;;  %v1549_v31 = vld [vmem:[%s2789_s1 + $0xf0] sm:$0xff] }
 0x291   :  { %v509_v26 = vpop.f32.mrf.mxu1  ;;  %v376_v8 = vadd.f32 %v1549_v31, %v2215_v17 }
 0x292   :  { %679 = vst [vmem:[%s2793_s6 + $0x60] sm:$0xff] %v647_v12  ;;  %v616_v28 = vadd.f32 %v509_v26, %v359_v24  ;;  %1415 = vmatprep.mubr.f32.mxu0 %v647_v12  ;;  %v1540_v12 = vld [vmem:[%s2789_s1 + $0xa8] sm:$0xff] }
 0x293   :  { %v511_v32 = vpop.f32.mrf.mxu1  ;;  %v367_v26 = vadd.f32 %v1540_v12, %v2188_v20 }
 0x294   :  { %v648_v36 = vmul.f32 0.33333334, %v616_v28 }
 0x295   :  { %v514_v37 = vpop.f32.mrf.mxu1 }
 0x296   :  { %680 = vst [vmem:[%s2793_s6 + $0x68] sm:$0xff] %v648_v36  ;;  %v617_v38 = vadd.f32 %v514_v37, %v360_v35  ;;  %1416 = vmatmul.mubr.f32.gmra.mxu0 %v648_v36  ;;  %v368_v35 = vadd.f32 %v1541_v34, %v2194_v21 }
 0x297   :  { %v516_v39 = vpop.f32.mrf.mxu1 }
 0x298   :  { %v649_v43 = vmul.f32 0.33333334, %v617_v38  ;;  %v1542_v39 = vld [vmem:[%s2789_s1 + $0xb8] sm:$0xff] }
 0x299   :  { %v519_v44 = vpop.f32.mrf.mxu1  ;;  %v369_v40 = vadd.f32 %v1542_v39, %v2200_v22 }
 0x29a   :  { %681 = vst [vmem:[%s2793_s6 + $0x70] sm:$0xff] %v649_v43  ;;  %v618_v45 = vadd.f32 %v519_v44, %v361_v42  ;;  %1418 = vmatprep.mubr.f32.mxu0 %v649_v43  ;;  %v1543_v44 = vld [vmem:[%s2789_s1 + $0xc0] sm:$0xff] }
 0x29b   :  { %v521_v46 = vpop.f32.mrf.mxu1 }
 0x29c   :  { %v650_v49 = vmul.f32 0.33333334, %v618_v45  ;;  %v370_v45 = vadd.f32 %v1543_v44, %v2203_v23 }
 0x29d   :  { %v524_v50 = vpop.f32.mrf.mxu1 }
 0x29e   :  { %682 = vst [vmem:[%s2793_s6 + $0x78] sm:$0xff] %v650_v49  ;;  %v619_v51 = vadd.f32 %v524_v50, %v362_v48  ;;  %1419 = vmatmul.mubr.f32.gmra.mxu0 %v650_v49  ;;  %v1544_v49 = vld [vmem:[%s2789_s1 + $0xc8] sm:$0xff] }
 0x29f   :  { %v526_v52 = vpop.f32.mrf.mxu1  ;;  %v371_v50 = vadd.f32 %v1544_v49, %v2205_v25 }
 0x2a0   :  { %v651_v55 = vmul.f32 0.33333334, %v619_v51 }
 0x2a1   :  { %v529_v56 = vpop.f32.mrf.mxu1 }
 0x2a2   :  { %683 = vst [vmem:[%s2793_s6 + $0x80] sm:$0xff] %v651_v55  ;;  %v620_v14 = vadd.f32 %v529_v56, %v363_v54  ;;  %1421 = vmatprep.mubr.f32.mxu0 %v651_v55  ;;  %v1545_v54 = vld [vmem:[%s2789_s1 + $0xd0] sm:$0xff] }
 0x2a3   :  { %v531_v57 = vpop.f32.mrf.mxu1  ;;  %v372_v55 = vadd.f32 %v1545_v54, %v2207_v27 }
 0x2a4   :  { %v652_v60 = vmul.f32 0.33333334, %v620_v14 }
 0x2a5   :  { %v534_v61 = vpop.f32.mrf.mxu1 }
 0x2a6   :  { %684 = vst [vmem:[%s2793_s6 + $0x88] sm:$0xff] %v652_v60  ;;  %v621_v62 = vadd.f32 %v534_v61, %v364_v59  ;;  %1422 = vmatmul.mubr.f32.gmra.mxu0 %v652_v60  ;;  %v373_v59 = vadd.f32 %v1546_v58, %v2209_v30 }
 0x2a7   :  { %v536_v63 = vpop.f32.mrf.mxu1 }
 0x2a8   :  { %v653_v3 = vmul.f32 0.33333334, %v621_v62  ;;  %v1547_v62 = vld [vmem:[%s2789_s1 + $0xe0] sm:$0xff] }
 0x2a9   :  { %v539_v4 = vpop.f32.mrf.mxu1  ;;  %v374_v63 = vadd.f32 %v1547_v62, %v2211_v15 }
 0x2aa   :  { %685 = vst [vmem:[%s2793_s6 + $0x90] sm:$0xff] %v653_v3  ;;  %v622_v6 = vadd.f32 %v539_v4, %v365_v2  ;;  %1424 = vmatprep.mubr.f32.mxu0 %v653_v3  ;;  %v1548_v3 = vld [vmem:[%s2789_s1 + $0xe8] sm:$0xff] }
 0x2ab   :  { %v541_v7 = vpop.f32.mrf.mxu1  ;;  %v375_v4 = vadd.f32 %v1548_v3, %v2213_v0 }
 0x2ac   :  { %v654_v10 = vmul.f32 0.33333334, %v622_v6 }
 0x2ad   :  { %v544_v11 = vpop.f32.mrf.mxu1 }
 0x2ae   :  { %686 = vst [vmem:[%s2793_s6 + $0x98] sm:$0xff] %v654_v10  ;;  %v623_v16 = vadd.f32 %v544_v11, %v366_v9  ;;  %1425 = vmatmul.mubr.f32.gmra.mxu0 %v654_v10 }
 0x2af   :  { %v546_v24 = vpop.f32.mrf.mxu1 }
 0x2b0   :  { %v655_v28 = vmul.f32 0.33333334, %v623_v16  ;;  %v1550_v16 = vld [vmem:[%s2789_s1 + $0xf8] sm:$0xff] }
 0x2b1   :  { %v549_v32 = vpop.f32.mrf.mxu1  ;;  %v377_v24 = vadd.f32 %v1550_v16, %v2217_v18 }
 0x2b2   :  { %687 = vst [vmem:[%s2793_s6 + $0xa0] sm:$0xff] %v655_v28  ;;  %v624_v19 = vadd.f32 %v549_v32, %v367_v26  ;;  %1427 = vmatprep.mubr.f32.mxu0 %v655_v28 }
 0x2b3   :  { %v551_v33 = vpop.f32.mrf.mxu1 }
 0x2b4   :  { %v656_v36 = vmul.f32 0.33333334, %v624_v19  ;;  %v2622_v19 = vld [vmem:[%s2794_s3] ss:$0 sm:$0xff] }
 0x2b5   :  { %v554_v37 = vpop.f32.mrf.mxu1 }
 0x2b6   :  { %688 = vst [vmem:[%s2793_s6 + $0xa8] sm:$0xff] %v656_v36  ;;  %v625_v20 = vadd.f32 %v554_v37, %v368_v35  ;;  %1428 = vmatmul.mubr.f32.gmra.mxu0 %v656_v36 }
 0x2b7   :  { %v556_v38 = vpop.f32.mrf.mxu1 }
 0x2b8   :  { %v657_v41 = vmul.f32 0.33333334, %v625_v20 }
 0x2b9   :  { %v559_v42 = vpop.f32.mrf.mxu1 }
 0x2ba   :  { %689 = vst [vmem:[%s2793_s6 + $0xb0] sm:$0xff] %v657_v41  ;;  %v626_v21 = vadd.f32 %v559_v42, %v369_v40  ;;  %1430 = vmatprep.mubr.f32.mxu0 %v657_v41 }
 0x2bb   :  { %v561_v43 = vpop.f32.mrf.mxu1 }
 0x2bc   :  { %v658_v46 = vmul.f32 0.33333334, %v626_v21 }
 0x2bd   :  { %v564_v47 = vpop.f32.mrf.mxu1 }
 0x2be   :  { %690 = vst [vmem:[%s2793_s6 + $0xb8] sm:$0xff] %v658_v46  ;;  %v627_v22 = vadd.f32 %v564_v47, %v370_v45  ;;  %1431 = vmatmul.mubr.f32.gmra.mxu0 %v658_v46 }
 0x2bf   :  { %v566_v48 = vpop.f32.mrf.mxu1 }
 0x2c0   :  { %v659_v51 = vmul.f32 0.33333334, %v627_v22 }
 0x2c1   :  { %v569_v52 = vpop.f32.mrf.mxu1 }
 0x2c2   :  { %691 = vst [vmem:[%s2793_s6 + $0xc0] sm:$0xff] %v659_v51  ;;  %v628_v23 = vadd.f32 %v569_v52, %v371_v50  ;;  %1433 = vmatprep.mubr.f32.mxu0 %v659_v51 }
 0x2c3   :  { %v571_v53 = vpop.f32.mrf.mxu1 }
 0x2c4   :  { %v660_v56 = vmul.f32 0.33333334, %v628_v23 }
 0x2c5   :  { %v574_v14 = vpop.f32.mrf.mxu1 }
 0x2c6   :  { %692 = vst [vmem:[%s2793_s6 + $0xc8] sm:$0xff] %v660_v56  ;;  %v629_v25 = vadd.f32 %v574_v14, %v372_v55  ;;  %1434 = vmatmul.mubr.f32.gmra.mxu0 %v660_v56 }
 0x2c7   :  { %v576_v57 = vpop.f32.mrf.mxu1 }
 0x2c8   :  { %v661_v60 = vmul.f32 0.33333334, %v629_v25 }
 0x2c9   :  { %v579_v61 = vpop.f32.mrf.mxu1 }
 0x2ca   :  { %693 = vst [vmem:[%s2793_s6 + $0xd0] sm:$0xff] %v661_v60  ;;  %v630_v27 = vadd.f32 %v579_v61, %v373_v59  ;;  %1436 = vmatprep.mubr.f32.mxu0 %v661_v60 }
 0x2cb   :  { %v581_v29 = vpop.f32.mrf.mxu1 }
 0x2cc   :  { %v662_v1 = vmul.f32 0.33333334, %v630_v27 }
 0x2cd   :  { %v584_v13 = vpop.f32.mrf.mxu1 }
 0x2ce   :  { %694 = vst [vmem:[%s2793_s6 + $0xd8] sm:$0xff] %v662_v1  ;;  %v631_v30 = vadd.f32 %v584_v13, %v374_v63  ;;  %1437 = vmatmul.mubr.f32.gmra.mxu0 %v662_v1 }
 0x2cf   :  { %v586_v2 = vpop.f32.mrf.mxu1 }
 0x2d0   :  { %v663_v5 = vmul.f32 0.33333334, %v631_v30 }
 0x2d1   :  { %v589_v6 = vpop.f32.mrf.mxu1 }
 0x2d2   :  { %695 = vst [vmem:[%s2793_s6 + $0xe0] sm:$0xff] %v663_v5  ;;  %v632_v15 = vadd.f32 %v589_v6, %v375_v4  ;;  %1439 = vmatprep.mubr.f32.mxu0 %v663_v5 }
 0x2d3   :  { %v591_v7 = vpop.f32.mrf.mxu1 }
 0x2d4   :  { %v664_v9 = vmul.f32 0.33333334, %v632_v15 }
 0x2d5   :  { %v594_v10 = vpop.f32.mrf.mxu1 }
 0x2d6   :  { %696 = vst [vmem:[%s2793_s6 + $0xe8] sm:$0xff] %v664_v9  ;;  %v633_v0 = vadd.f32 %v594_v10, %v376_v8  ;;  %1440 = vmatmul.mubr.f32.gmra.mxu0 %v664_v9 }
 0x2d7   :  { %v596_v11 = vpop.f32.mrf.mxu1 }
 0x2d8   :  { %v665_v12 = vmul.f32 0.33333334, %v633_v0 }
 0x2d9   :  { %v599_v26 = vpop.f32.mrf.mxu1 }
 0x2da   :  { %697 = vst [vmem:[%s2793_s6 + $0xf0] sm:$0xff] %v665_v12  ;;  %v634_v17 = vadd.f32 %v599_v26, %v377_v24  ;;  %1442 = vmatprep.mubr.f32.mxu0 %v665_v12 }
 0x2db   :  { %v601_v28 = vpop.f32.mrf.mxu1 }
 0x2dc   :  { %v666_v32 = vmul.f32 0.33333334, %v634_v17 }
 0x2de   :  { %698 = vst [vmem:[%s2793_s6 + $0xf8] sm:$0xff] %v666_v32  ;;  %1443 = vmatmul.mubr.f32.gmra.mxu0 %v666_v32 }
 0x326   :  { %v1399_v18 = vpop.f32.mrf.mxu0 }
 0x327   :  { %v794_v33 = vadd.f32 %v1399_v18, %v2622_v19 }
 0x328   :  { %v788_v34 = vpop.f32.mrf.mxu0 }
 0x329   :  { %v789_v35 = vadd.f32 %v2622_v19, %v788_v34  ;;  %v948_v37 = vmax.f32 %v794_v33, 0.0 }
 0x32b   :  { %v947_v36 = vmax.f32 %v789_v35, 0.0 }
 0x32d   :  { %1477 = vmatprep.mubr.f32.mxu1 %v947_v36 }
 0x32e   :  { %v1402_v20 = vpop.f32.mrf.mxu0  ;;  %1478 = vmatmul.mubr.f32.vlgmr.msra.gmra.mxu1 %v948_v37 }
 0x32f   :  { %v804_v38 = vadd.f32 %v1402_v20, %v2622_v19 }
 0x330   :  { %v798_v39 = vpop.f32.mrf.mxu0 }
 0x331   :  { %v799_v40 = vadd.f32 %v2622_v19, %v798_v39  ;;  %v950_v42 = vmax.f32 %v804_v38, 0.0 }
 0x333   :  { %v949_v41 = vmax.f32 %v799_v40, 0.0 }
 0x335   :  { %1480 = vmatprep.mubr.f32.mxu1 %v949_v41 }
 0x336   :  { %v1405_v21 = vpop.f32.mrf.mxu0  ;;  %1481 = vmatmul.mubr.f32.gmra.mxu1 %v950_v42 }
 0x337   :  { %v814_v43 = vadd.f32 %v1405_v21, %v2622_v19 }
 0x338   :  { %v808_v44 = vpop.f32.mrf.mxu0 }
 0x339   :  { %v809_v45 = vadd.f32 %v2622_v19, %v808_v44  ;;  %v952_v47 = vmax.f32 %v814_v43, 0.0 }
 0x33b   :  { %v951_v46 = vmax.f32 %v809_v45, 0.0 }
 0x33d   :  { %1483 = vmatprep.mubr.f32.mxu1 %v951_v46 }
 0x33e   :  { %v1408_v22 = vpop.f32.mrf.mxu0  ;;  %1484 = vmatmul.mubr.f32.gmra.mxu1 %v952_v47 }
 0x33f   :  { %v824_v48 = vadd.f32 %v1408_v22, %v2622_v19 }
 0x340   :  { %v818_v49 = vpop.f32.mrf.mxu0 }
 0x341   :  { %v819_v50 = vadd.f32 %v2622_v19, %v818_v49  ;;  %v954_v52 = vmax.f32 %v824_v48, 0.0 }
 0x343   :  { %v953_v51 = vmax.f32 %v819_v50, 0.0 }
 0x345   :  { %1486 = vmatprep.mubr.f32.mxu1 %v953_v51 }
 0x346   :  { %v1411_v23 = vpop.f32.mrf.mxu0  ;;  %1487 = vmatmul.mubr.f32.gmra.mxu1 %v954_v52 }
 0x347   :  { %v834_v53 = vadd.f32 %v1411_v23, %v2622_v19 }
 0x348   :  { %v828_v54 = vpop.f32.mrf.mxu0 }
 0x349   :  { %v829_v55 = vadd.f32 %v2622_v19, %v828_v54  ;;  %v956_v14 = vmax.f32 %v834_v53, 0.0 }
 0x34b   :  { %v955_v56 = vmax.f32 %v829_v55, 0.0 }
 0x34d   :  { %1489 = vmatprep.mubr.f32.mxu1 %v955_v56 }
 0x34e   :  { %v1414_v25 = vpop.f32.mrf.mxu0  ;;  %1490 = vmatmul.mubr.f32.gmra.mxu1 %v956_v14 }
 0x34f   :  { %v844_v57 = vadd.f32 %v1414_v25, %v2622_v19 }
 0x350   :  { %v838_v58 = vpop.f32.mrf.mxu0 }
 0x351   :  { %v839_v59 = vadd.f32 %v2622_v19, %v838_v58  ;;  %v958_v61 = vmax.f32 %v844_v57, 0.0 }
 0x353   :  { %v957_v60 = vmax.f32 %v839_v59, 0.0  ;;  %v2659_v59 = vld [vmem:[%s2795_s5] ss:$0 sm:$0xff] }
 0x355   :  { %1492 = vmatprep.mubr.f32.mxu1 %v957_v60 }
 0x356   :  { %v1417_v27 = vpop.f32.mrf.mxu0  ;;  %1493 = vmatmul.mubr.f32.gmra.mxu1 %v958_v61 }
 0x357   :  { %v854_v29 = vadd.f32 %v1417_v27, %v2622_v19 }
 0x358   :  { %v848_v62 = vpop.f32.mrf.mxu0 }
 0x359   :  { %v849_v63 = vadd.f32 %v2622_v19, %v848_v62  ;;  %v960_v13 = vmax.f32 %v854_v29, 0.0 }
 0x35b   :  { %v959_v1 = vmax.f32 %v849_v63, 0.0 }
 0x35d   :  { %1495 = vmatprep.mubr.f32.mxu1 %v959_v1 }
 0x35e   :  { %v1420_v30 = vpop.f32.mrf.mxu0  ;;  %1496 = vmatmul.mubr.f32.gmra.mxu1 %v960_v13 }
 0x35f   :  { %v864_v2 = vadd.f32 %v1420_v30, %v2622_v19 }
 0x360   :  { %v858_v3 = vpop.f32.mrf.mxu0 }
 0x361   :  { %v859_v4 = vadd.f32 %v2622_v19, %v858_v3  ;;  %v962_v6 = vmax.f32 %v864_v2, 0.0 }
 0x363   :  { %v961_v5 = vmax.f32 %v859_v4, 0.0 }
 0x365   :  { %1498 = vmatprep.mubr.f32.mxu1 %v961_v5 }
 0x366   :  { %v1423_v15 = vpop.f32.mrf.mxu0  ;;  %1499 = vmatmul.mubr.f32.gmra.mxu1 %v962_v6 }
 0x367   :  { %v874_v7 = vadd.f32 %v1423_v15, %v2622_v19 }
 0x368   :  { %v868_v31 = vpop.f32.mrf.mxu0 }
 0x369   :  { %v869_v8 = vadd.f32 %v2622_v19, %v868_v31  ;;  %v964_v10 = vmax.f32 %v874_v7, 0.0 }
 0x36b   :  { %v963_v9 = vmax.f32 %v869_v8, 0.0 }
 0x36d   :  { %1501 = vmatprep.mubr.f32.mxu1 %v963_v9 }
 0x36e   :  { %v1426_v0 = vpop.f32.mrf.mxu0  ;;  %1502 = vmatmul.mubr.f32.gmra.mxu1 %v964_v10 }
 0x36f   :  { %v884_v11 = vadd.f32 %v1426_v0, %v2622_v19 }
 0x370   :  { %v878_v16 = vpop.f32.mrf.mxu0 }
 0x371   :  { %v879_v24 = vadd.f32 %v2622_v19, %v878_v16  ;;  %v966_v26 = vmax.f32 %v884_v11, 0.0 }
 0x373   :  { %v965_v12 = vmax.f32 %v879_v24, 0.0 }
 0x375   :  { %1504 = vmatprep.mubr.f32.mxu1 %v965_v12 }
 0x376   :  { %v1429_v17 = vpop.f32.mrf.mxu0  ;;  %1505 = vmatmul.mubr.f32.gmra.mxu1 %v966_v26 }
 0x377   :  { %v894_v28 = vadd.f32 %v1429_v17, %v2622_v19 }
 0x378   :  { %v888_v32 = vpop.f32.mrf.mxu0 }
 0x379   :  { %v889_v18 = vadd.f32 %v2622_v19, %v888_v32  ;;  %v968_v34 = vmax.f32 %v894_v28, 0.0 }
 0x37b   :  { %v967_v33 = vmax.f32 %v889_v18, 0.0 }
 0x37d   :  { %1507 = vmatprep.mubr.f32.mxu1 %v967_v33 }
 0x37e   :  { %v1432_v35 = vpop.f32.mrf.mxu0  ;;  %1508 = vmatmul.mubr.f32.gmra.mxu1 %v968_v34 }
 0x37f   :  { %v904_v36 = vadd.f32 %v1432_v35, %v2622_v19 }
 0x380   :  { %v898_v37 = vpop.f32.mrf.mxu0 }
 0x381   :  { %v899_v20 = vadd.f32 %v2622_v19, %v898_v37  ;;  %v970_v39 = vmax.f32 %v904_v36, 0.0 }
 0x383   :  { %v969_v38 = vmax.f32 %v899_v20, 0.0 }
 0x385   :  { %1510 = vmatprep.mubr.f32.mxu1 %v969_v38 }
 0x386   :  { %v1435_v40 = vpop.f32.mrf.mxu0  ;;  %1511 = vmatmul.mubr.f32.gmra.mxu1 %v970_v39 }
 0x387   :  { %v914_v41 = vadd.f32 %v1435_v40, %v2622_v19 }
 0x388   :  { %v908_v42 = vpop.f32.mrf.mxu0 }
 0x389   :  { %v909_v21 = vadd.f32 %v2622_v19, %v908_v42  ;;  %v972_v44 = vmax.f32 %v914_v41, 0.0 }
 0x38b   :  { %v971_v43 = vmax.f32 %v909_v21, 0.0 }
 0x38d   :  { %1513 = vmatprep.mubr.f32.mxu1 %v971_v43 }
 0x38e   :  { %v1438_v45 = vpop.f32.mrf.mxu0  ;;  %1514 = vmatmul.mubr.f32.gmra.mxu1 %v972_v44 }
 0x38f   :  { %v924_v46 = vadd.f32 %v1438_v45, %v2622_v19 }
 0x390   :  { %v918_v47 = vpop.f32.mrf.mxu0 }
 0x391   :  { %v919_v22 = vadd.f32 %v2622_v19, %v918_v47  ;;  %v974_v49 = vmax.f32 %v924_v46, 0.0 }
 0x393   :  { %v973_v48 = vmax.f32 %v919_v22, 0.0 }
 0x395   :  { %1516 = vmatprep.mubr.f32.mxu1 %v973_v48 }
 0x396   :  { %v1441_v50 = vpop.f32.mrf.mxu0  ;;  %1517 = vmatmul.mubr.f32.gmra.mxu1 %v974_v49 }
 0x397   :  { %v934_v51 = vadd.f32 %v1441_v50, %v2622_v19 }
 0x398   :  { %v928_v52 = vpop.f32.mrf.mxu0 }
 0x399   :  { %v929_v23 = vadd.f32 %v2622_v19, %v928_v52  ;;  %v976_v54 = vmax.f32 %v934_v51, 0.0 }
 0x39b   :  { %v975_v53 = vmax.f32 %v929_v23, 0.0 }
 0x39d   :  { %1519 = vmatprep.mubr.f32.mxu1 %v975_v53 }
 0x39e   :  { %v1444_v55 = vpop.f32.mrf.mxu0  ;;  %1520 = vmatmul.mubr.f32.gmra.mxu1 %v976_v54 }
 0x39f   :  { %v944_v56 = vadd.f32 %v1444_v55, %v2622_v19 }
 0x3a0   :  { %v938_v14 = vpop.f32.mrf.mxu0 }
 0x3a1   :  { %v939_v25 = vadd.f32 %v2622_v19, %v938_v14  ;;  %v978_v58 = vmax.f32 %v944_v56, 0.0 }
 0x3a3   :  { %v977_v57 = vmax.f32 %v939_v25, 0.0 }
 0x3a5   :  { %1522 = vmatprep.mubr.f32.mxu1 %v977_v57 }
 0x3a6   :  { %1523 = vmatmul.mubr.f32.gmra.mxu1 %v978_v58 }
 0x3ee   :  { %v1479_v60 = vpop.f32.mrf.mxu1 }
 0x3ef   :  { %v1074_v61 = vadd.f32 %v1479_v60, %v2659_v59 }
 0x3f0   :  { %v1068_v27 = vpop.f32.mrf.mxu1 }
 0x3f1   :  { %1228 = vst [vmem:[%s2796_s7 + $0x8] sm:$0xff] %v1074_v61  ;;  %v1069_v29 = vadd.f32 %v2659_v59, %v1068_v27 }
 0x3f3   :  { %1227 = vst [vmem:[%s2796_s7] sm:$0xff] %v1069_v29 }
 0x3f6   :  { %v1482_v19 = vpop.f32.mrf.mxu1 }
 0x3f7   :  { %v1084_v62 = vadd.f32 %v1482_v19, %v2659_v59 }
 0x3f8   :  { %v1078_v63 = vpop.f32.mrf.mxu1 }
 0x3f9   :  { %1230 = vst [vmem:[%s2796_s7 + $0x18] sm:$0xff] %v1084_v62  ;;  %v1079_v1 = vadd.f32 %v2659_v59, %v1078_v63 }
 0x3fb   :  { %1229 = vst [vmem:[%s2796_s7 + $0x10] sm:$0xff] %v1079_v1 }
 0x3fe   :  { %v1485_v13 = vpop.f32.mrf.mxu1 }
 0x3ff   :  { %v1094_v30 = vadd.f32 %v1485_v13, %v2659_v59 }
 0x400   :  { %v1088_v2 = vpop.f32.mrf.mxu1 }
 0x401   :  { %1232 = vst [vmem:[%s2796_s7 + $0x28] sm:$0xff] %v1094_v30  ;;  %v1089_v3 = vadd.f32 %v2659_v59, %v1088_v2 }
 0x403   :  { %1231 = vst [vmem:[%s2796_s7 + $0x20] sm:$0xff] %v1089_v3 }
 0x406   :  { %v1488_v4 = vpop.f32.mrf.mxu1 }
 0x407   :  { %v1104_v5 = vadd.f32 %v1488_v4, %v2659_v59 }
 0x408   :  { %v1098_v6 = vpop.f32.mrf.mxu1 }
 0x409   :  { %1234 = vst [vmem:[%s2796_s7 + $0x38] sm:$0xff] %v1104_v5  ;;  %v1099_v15 = vadd.f32 %v2659_v59, %v1098_v6 }
 0x40b   :  { %1233 = vst [vmem:[%s2796_s7 + $0x30] sm:$0xff] %v1099_v15 }
 0x40e   :  { %v1491_v7 = vpop.f32.mrf.mxu1 }
 0x40f   :  { %v1114_v31 = vadd.f32 %v1491_v7, %v2659_v59 }
 0x410   :  { %v1108_v8 = vpop.f32.mrf.mxu1 }
 0x411   :  { %1236 = vst [vmem:[%s2796_s7 + $0x48] sm:$0xff] %v1114_v31  ;;  %v1109_v9 = vadd.f32 %v2659_v59, %v1108_v8 }
 0x413   :  { %1235 = vst [vmem:[%s2796_s7 + $0x40] sm:$0xff] %v1109_v9 }
 0x416   :  { %v1494_v10 = vpop.f32.mrf.mxu1 }
 0x417   :  { %v1124_v0 = vadd.f32 %v1494_v10, %v2659_v59 }
 0x418   :  { %v1118_v11 = vpop.f32.mrf.mxu1 }
 0x419   :  { %1238 = vst [vmem:[%s2796_s7 + $0x58] sm:$0xff] %v1124_v0  ;;  %v1119_v16 = vadd.f32 %v2659_v59, %v1118_v11 }
 0x41b   :  { %1237 = vst [vmem:[%s2796_s7 + $0x50] sm:$0xff] %v1119_v16 }
 0x41e   :  { %v1497_v24 = vpop.f32.mrf.mxu1 }
 0x41f   :  { %v1134_v12 = vadd.f32 %v1497_v24, %v2659_v59 }
 0x420   :  { %v1128_v26 = vpop.f32.mrf.mxu1 }
 0x421   :  { %1240 = vst [vmem:[%s2796_s7 + $0x68] sm:$0xff] %v1134_v12  ;;  %v1129_v17 = vadd.f32 %v2659_v59, %v1128_v26 }
 0x423   :  { %1239 = vst [vmem:[%s2796_s7 + $0x60] sm:$0xff] %v1129_v17 }
 0x426   :  { %v1500_v28 = vpop.f32.mrf.mxu1 }
 0x427   :  { %v1144_v32 = vadd.f32 %v1500_v28, %v2659_v59 }
 0x428   :  { %v1138_v18 = vpop.f32.mrf.mxu1 }
 0x429   :  { %1242 = vst [vmem:[%s2796_s7 + $0x78] sm:$0xff] %v1144_v32  ;;  %v1139_v33 = vadd.f32 %v2659_v59, %v1138_v18 }
 0x42b   :  { %1241 = vst [vmem:[%s2796_s7 + $0x70] sm:$0xff] %v1139_v33 }
 0x42e   :  { %v1503_v34 = vpop.f32.mrf.mxu1 }
 0x42f   :  { %v1154_v35 = vadd.f32 %v1503_v34, %v2659_v59 }
 0x430   :  { %v1148_v36 = vpop.f32.mrf.mxu1 }
 0x431   :  { %1244 = vst [vmem:[%s2796_s7 + $0x88] sm:$0xff] %v1154_v35  ;;  %v1149_v37 = vadd.f32 %v2659_v59, %v1148_v36 }
 0x433   :  { %1243 = vst [vmem:[%s2796_s7 + $0x80] sm:$0xff] %v1149_v37 }
 0x436   :  { %v1506_v20 = vpop.f32.mrf.mxu1 }
 0x437   :  { %v1164_v38 = vadd.f32 %v1506_v20, %v2659_v59 }
 0x438   :  { %v1158_v39 = vpop.f32.mrf.mxu1 }
 0x439   :  { %1246 = vst [vmem:[%s2796_s7 + $0x98] sm:$0xff] %v1164_v38  ;;  %v1159_v40 = vadd.f32 %v2659_v59, %v1158_v39 }
 0x43b   :  { %1245 = vst [vmem:[%s2796_s7 + $0x90] sm:$0xff] %v1159_v40 }
 0x43e   :  { %v1509_v41 = vpop.f32.mrf.mxu1 }
 0x43f   :  { %v1174_v42 = vadd.f32 %v1509_v41, %v2659_v59 }
 0x440   :  { %v1168_v21 = vpop.f32.mrf.mxu1 }
 0x441   :  { %1248 = vst [vmem:[%s2796_s7 + $0xa8] sm:$0xff] %v1174_v42  ;;  %v1169_v43 = vadd.f32 %v2659_v59, %v1168_v21 }
 0x443   :  { %1247 = vst [vmem:[%s2796_s7 + $0xa0] sm:$0xff] %v1169_v43 }
 0x446   :  { %v1512_v44 = vpop.f32.mrf.mxu1 }
 0x447   :  { %v1184_v45 = vadd.f32 %v1512_v44, %v2659_v59 }
 0x448   :  { %v1178_v46 = vpop.f32.mrf.mxu1 }
 0x449   :  { %1250 = vst [vmem:[%s2796_s7 + $0xb8] sm:$0xff] %v1184_v45  ;;  %v1179_v47 = vadd.f32 %v2659_v59, %v1178_v46 }
 0x44b   :  { %1249 = vst [vmem:[%s2796_s7 + $0xb0] sm:$0xff] %v1179_v47 }
 0x44e   :  { %v1515_v22 = vpop.f32.mrf.mxu1 }
 0x44f   :  { %v1194_v48 = vadd.f32 %v1515_v22, %v2659_v59 }
 0x450   :  { %v1188_v49 = vpop.f32.mrf.mxu1 }
 0x451   :  { %1252 = vst [vmem:[%s2796_s7 + $0xc8] sm:$0xff] %v1194_v48  ;;  %v1189_v50 = vadd.f32 %v2659_v59, %v1188_v49 }
 0x453   :  { %1251 = vst [vmem:[%s2796_s7 + $0xc0] sm:$0xff] %v1189_v50 }
 0x456   :  { %v1518_v51 = vpop.f32.mrf.mxu1 }
 0x457   :  { %v1204_v52 = vadd.f32 %v1518_v51, %v2659_v59 }
 0x458   :  { %v1198_v23 = vpop.f32.mrf.mxu1 }
 0x459   :  { %1254 = vst [vmem:[%s2796_s7 + $0xd8] sm:$0xff] %v1204_v52  ;;  %v1199_v53 = vadd.f32 %v2659_v59, %v1198_v23 }
 0x45b   :  { %1253 = vst [vmem:[%s2796_s7 + $0xd0] sm:$0xff] %v1199_v53 }
 0x45e   :  { %v1521_v54 = vpop.f32.mrf.mxu1 }
 0x45f   :  { %v1214_v55 = vadd.f32 %v1521_v54, %v2659_v59 }
 0x460   :  { %v1208_v56 = vpop.f32.mrf.mxu1 }
 0x461   :  { %1256 = vst [vmem:[%s2796_s7 + $0xe8] sm:$0xff] %v1214_v55  ;;  %v1209_v14 = vadd.f32 %v2659_v59, %v1208_v56 }
 0x463   :  { %1255 = vst [vmem:[%s2796_s7 + $0xe0] sm:$0xff] %v1209_v14 }
 0x466   :  { %v1524_v25 = vpop.f32.mrf.mxu1 }
 0x467   :  { %v1224_v57 = vadd.f32 %v1524_v25, %v2659_v59 }
 0x468   :  { %v1218_v58 = vpop.f32.mrf.mxu1 }
 0x469   :  { %1258 = vst [vmem:[%s2796_s7 + $0xf8] sm:$0xff] %v1224_v57  ;;  %v1219_v60 = vadd.f32 %v2659_v59, %v1218_v58 }
 0x46b   :  { %1257 = vst [vmem:[%s2796_s7 + $0xf0] sm:$0xff] %v1219_v60 }

</bundles_post_ra>
